<compile_context>
chip_gen: v6e
topology: v6e:2x2x1
jax: 0.10.0
libtpu: 0.0.40
codegen_flags: <defaults>
</compile_context>

<pallas_src>
import random
import string as _string
from functools import partial

import numpy as np
import jax
import jax.numpy as jnp
from jax.experimental import pallas as pl
from jax.experimental.pallas import tpu as pltpu

TENSES = ['sp', 'tp', 'pg', 'p']

ITERATION = 500
WORDS_PER_ITER = 4908
TEACHER_START = 150 * WORDS_PER_ITER

# ---- model hyperparameters consistent with the module ----
VOCAB_SIZE = 32
EMBEDDING_SIZE = 32
CON_EMBEDDING_SIZE = 8
HIDDEN_SIZE = 32
LATENT_SIZE = 16
PAD_IDX, SOW_IDX, EOW_IDX = 0, 1, 2

_E, _H, _L, _CE, _V = (EMBEDDING_SIZE, HIDDEN_SIZE, LATENT_SIZE,
                       CON_EMBEDDING_SIZE, VOCAB_SIZE)

# -------- static row offsets of the packed 128-lane weight slab (w128) --------
R_IH_ENC = 0                      # (E, 4H)  encoder W_ih.T
R_HH_ENC = R_IH_ENC + _E          # (H, 4H)  encoder W_hh.T
R_HH_DEC = R_HH_ENC + _H          # (H, 4H)  decoder W_hh.T
R_EMBX = R_HH_DEC + _H            # (V, 4H)  emb @ decoder W_ih.T + b_dec (greedy table)
R_IH_DEC = R_EMBX + _V            # (E, 4H)  decoder W_ih.T (teacher-forcing precompute)
R_B_ENC = R_IH_DEC + _E           # (1, 4H)  encoder b_ih + b_hh
R_B_DEC = R_B_ENC + 1             # (1, 4H)  decoder b_ih + b_hh
W128_ROWS = R_B_DEC + 1           # = 162

# -------- static row offsets of the packed 64-lane weight slab (w64) ----------
R_PROJ = 0                        # (2H, 4L) block-diag: [h|c] -> [h_mu|c_mu|h_lv|c_lv]
R_Z2RNN = R_PROJ + 2 * _H         # (2L, 2H) block-diag: [h_z|c_z] -> [dec_h|dec_c]
R_CE2RNN = R_Z2RNN + 2 * _L       # (E, 2H)  con-embedding rows (zero-padded CE..E)
R_OUTW = R_CE2RNN + _E            # (H, 2H)  out2vocab.T in lanes [0:V]
R_B_PROJ = R_OUTW + _H            # (1, 4L)
R_B_LAT = R_B_PROJ + 1            # (1, 2H)
R_B_OUT = R_B_LAT + 1             # (1, 2H)  out2vocab bias in lanes [0:V]
W64_ROWS = R_B_OUT + 1            # = 163


def teacher_forcing_scheduler(nth_iter):
    return 1 if nth_iter <= TEACHER_START else \
        1 - (nth_iter - TEACHER_START) / (ITERATION * WORDS_PER_ITER - TEACHER_START) / 2


def idx_ch_arr_to_string(idx_ch_arr, i2w, eow_idx):
    for i, idx_ch in enumerate(idx_ch_arr):
        if idx_ch == eow_idx:
            return ''.join([i2w[str(int(idx))] for idx in idx_ch_arr[:i]])
    return ''.join([i2w[str(int(idx))] for idx in idx_ch_arr])


# ------------------------------- kernel -------------------------------------

def _gate_update(gates, c):
    """PyTorch LSTM cell update from precomputed gate pre-activations (B, 4H).

    Full-width sigmoid/tanh over the gate vreg (EUP), then static lane slices
    per gate (order i, f, g, o)."""
    H = HIDDEN_SIZE
    sig = jax.nn.sigmoid(gates)
    th = jnp.tanh(gates)
    i = sig[:, 0 * H:1 * H]
    f = sig[:, 1 * H:2 * H]
    g = th[:, 2 * H:3 * H]
    o = sig[:, 3 * H:4 * H]
    c_new = f * c + i * g
    h_new = o * jnp.tanh(c_new)
    return h_new, c_new


def cvae_fused_kernel(act_ref, w128_ref, w64_ref, out_ref, *,
                      use_tf, n_t, n_dec, batch):
    B = batch
    E, H, L, CE, V = _E, _H, _L, _CE, _V

    # ---- static row offsets inside the packed activation slab (width 32) ----
    o_x = 0                           # (T*B, E)   time-major embedded inputs
    o_tgt = o_x + n_t * B             # (TL*B, E)  time-major embedded targets
    o_mask = o_tgt + n_dec * B        # (T*B, H)   pack_padded_sequence 0/1 mask
    o_h0 = o_mask + n_t * B           # (B, H)     encoder h0 (== c0)
    o_noise = o_h0 + B                # (B, 2L)    reparameterization noise
    o_con = o_noise + B               # (B, E)     target con-embedding (lanes CE: zero)

    # ---- hoisted weight views (static slices of the two packed slabs) ----
    w_ih_enc = w128_ref[R_IH_ENC:R_IH_ENC + E, :]
    w_hh_enc = w128_ref[R_HH_ENC:R_HH_ENC + H, :]
    w_hh_dec = w128_ref[R_HH_DEC:R_HH_DEC + H, :]
    embx = w128_ref[R_EMBX:R_EMBX + V, :]            # emb @ W_ih_dec.T + b_dec
    b_enc = w128_ref[R_B_ENC:R_B_ENC + 1, :]

    # ---------------- encoder LSTM (unrolled, vreg-carried state) -----------
    # One-shot input projection for all T steps (off the serial chain).
    x_flat = act_ref[o_x:o_x + n_t * B, :]                         # (T*B, E)
    enc_gx = jnp.dot(x_flat, w_ih_enc,
                     preferred_element_type=jnp.float32) + b_enc   # (T*B, 4H)

    # PyTorch init_hidden: hidden == cell == [zeros(H-CE) | con_embed(input_tense)]
    h = act_ref[o_h0:o_h0 + B, :]
    c = h
    for t in range(n_t):
        gates = enc_gx[t * B:(t + 1) * B, :] + jnp.dot(
            h, w_hh_enc, preferred_element_type=jnp.float32)
        h_new, c_new = _gate_update(gates, c)
        # pack_padded_sequence semantics: state only advances while t < length
        m = act_ref[o_mask + t * B:o_mask + (t + 1) * B, :]        # (B, H) 0/1
        h = jnp.where(m > 0.0, h_new, h)
        c = jnp.where(m > 0.0, c_new, c)

    # -------- latent: fused block-diagonal projections + reparameterize -----
    w_proj = w64_ref[R_PROJ:R_PROJ + 2 * H, :]                     # (2H, 4L)
    b_proj = w64_ref[R_B_PROJ:R_B_PROJ + 1, :]
    proj = jnp.dot(jnp.concatenate([h, c], axis=-1), w_proj,
                   preferred_element_type=jnp.float32) + b_proj    # [h_mu|c_mu|h_lv|c_lv]

    noise = act_ref[o_noise:o_noise + B, :]                        # (B, 2L)
    z = proj[:, :2 * L] + noise * jnp.exp(0.5 * proj[:, 2 * L:])   # (B, 2L) = [h_z|c_z]

    w_z2rnn = w64_ref[R_Z2RNN:R_Z2RNN + 2 * L, :]                  # (2L, 2H) block-diag
    w_ce2rnn = w64_ref[R_CE2RNN:R_CE2RNN + E, :]                   # (E, 2H), rows CE..E zero
    b_lat = w64_ref[R_B_LAT:R_B_LAT + 1, :]
    ce_row = act_ref[o_con:o_con + B, :]                           # (B, E), lanes CE: zero
    ce_gx = jnp.dot(ce_row, w_ce2rnn,
                    preferred_element_type=jnp.float32) + b_lat    # (B, 2H)
    dec_hc = jnp.dot(z, w_z2rnn,
                     preferred_element_type=jnp.float32) + ce_gx   # (B, 2H) = [dec_h|dec_c]
    h = dec_hc[:, :H]
    c = dec_hc[:, H:]

    # --------------- decoder LSTM (unrolled, single lane-dense store) -------
    out_w = w64_ref[R_OUTW:R_OUTW + H, 0:V]                        # (H, V), hoisted slice
    out_b = jnp.broadcast_to(w64_ref[R_B_OUT:R_B_OUT + 1, 0:V], (B, V))

    if use_tf:
        # teacher forcing: all target-char input projections in one matmul
        w_ih_dec = w128_ref[R_IH_DEC:R_IH_DEC + E, :]
        b_dec = w128_ref[R_B_DEC:R_B_DEC + 1, :]
        tgt_flat = act_ref[o_tgt:o_tgt + n_dec * B, :]             # (TL*B, E)
        tgt_gx = jnp.dot(tgt_flat, w_ih_dec,
                         preferred_element_type=jnp.float32) + b_dec
    else:
        iota = jax.lax.broadcasted_iota(jnp.int32, (B, V), 1)
        low_bits = max(1, (V - 1).bit_length())                    # 5 for V=32

    # step-0 input = SOW embedding, already projected through W_ih_dec (+bias)
    x_gates = jnp.broadcast_to(embx[SOW_IDX:SOW_IDX + 1, :], (B, 4 * H))

    chunks = [proj]                                                # stats -> lanes [0:4L]
    for di in range(n_dec):
        gates = x_gates + jnp.dot(h, w_hh_dec, preferred_element_type=jnp.float32)
        h, c = _gate_update(gates, c)
        logits = jnp.dot(h, out_w, preferred_element_type=jnp.float32) + out_b
        chunks.append(logits)
        if di + 1 < n_dec:
            if use_tf:
                x_gates = tgt_gx[di * B:(di + 1) * B, :]
            else:
                # single-pass first-index argmax: monotone int32 key from the
                # float bits, (V-1-index) packed in the low bits (tie-break =
                # first index of the max, matching torch.argmax).
                bits = pltpu.bitcast(logits, jnp.int32)
                key = jnp.where(bits < 0, bits ^ jnp.int32(0x7FFFFFFF), bits)
                packed = (key & jnp.int32(-(1 << low_bits))) | (jnp.int32(V - 1) - iota)
                kmax = jnp.max(packed, axis=-1, keepdims=True)
                onehot = (packed == kmax).astype(jnp.float32)
                # next-step input gates straight from the prepacked table
                x_gates = jnp.dot(onehot, embx, preferred_element_type=jnp.float32)

    # one lane-dense store: [stats (4L) | logits step0 .. step n_dec-1]
    out_ref[...] = jnp.concatenate(chunks, axis=-1)


# ----------------------------- pallas wrapper --------------------------------

def cvae_fused(act, w128, w64, *, n_t, batch, decode_len, use_tf):
    out_width = 4 * LATENT_SIZE + decode_len * VOCAB_SIZE

    def full(a):
        return pl.BlockSpec(a.shape, lambda i, _n=a.ndim: (0,) * _n)

    return pl.pallas_call(
        partial(cvae_fused_kernel, use_tf=use_tf, n_t=n_t, n_dec=decode_len,
                batch=batch),
        out_shape=jax.ShapeDtypeStruct((batch, out_width), jnp.float32),
        grid=(1,),
        in_specs=[full(act), full(w128), full(w64)],
        out_specs=pl.BlockSpec((batch, out_width), lambda i: (0, 0)),
        compiler_params=pltpu.CompilerParams(dimension_semantics=("arbitrary",)),
    )(act, w128, w64)


# ------------------------------ params & packing -----------------------------

def init_params(key):
    """Logical parameters in PyTorch layout (nn.LSTM gate order [i,f,g,o],
    nn.Linear weight as (out_features, in_features))."""
    H, E, L, CE, V = _H, _E, _L, _CE, _V
    shapes = {
        'embedding': (V, E),
        'con_embedding': (len(TENSES), CE),
        'en_w_ih': (4 * H, E), 'en_w_hh': (4 * H, H),
        'en_b_ih': (4 * H,), 'en_b_hh': (4 * H,),
        'de_w_ih': (4 * H, E), 'de_w_hh': (4 * H, H),
        'de_b_ih': (4 * H,), 'de_b_hh': (4 * H,),
        'h2mu_w': (L, H), 'h2mu_b': (L,),
        'h2lv_w': (L, H), 'h2lv_b': (L,),
        'c2mu_w': (L, H), 'c2mu_b': (L,),
        'c2lv_w': (L, H), 'c2lv_b': (L,),
        'hl2rnn_w': (H, L + CE), 'hl2rnn_b': (H,),
        'cl2rnn_w': (H, L + CE), 'cl2rnn_b': (H,),
        'out_w': (V, H), 'out_b': (V,),
    }
    keys = jax.random.split(key, len(shapes))
    return {name: jax.random.uniform(k, shp, jnp.float32, -0.1, 0.1)
            for k, (name, shp) in zip(keys, shapes.items())}


def pack_params(p):
    """One-time repack of PyTorch-layout params into the two kernel weight slabs."""
    H, E, L, CE, V = _H, _E, _L, _CE, _V
    f32 = jnp.float32

    w_ih_enc = p['en_w_ih'].T                                     # (E, 4H)
    w_hh_enc = p['en_w_hh'].T                                     # (H, 4H)
    b_enc = (p['en_b_ih'] + p['en_b_hh']).reshape(1, 4 * H)
    w_ih_dec = p['de_w_ih'].T
    w_hh_dec = p['de_w_hh'].T
    b_dec = (p['de_b_ih'] + p['de_b_hh']).reshape(1, 4 * H)
    # greedy-path table: per-vocab-row decoder input projection, bias folded in
    embx = p['embedding'] @ w_ih_dec + b_dec                      # (V, 4H)

    w128 = jnp.concatenate(
        [w_ih_enc, w_hh_enc, w_hh_dec, embx, w_ih_dec, b_enc, b_dec], axis=0)
    assert w128.shape == (W128_ROWS, 4 * H)

    # block-diag projection: [h | c] -> [h_mu | c_mu | h_lv | c_lv]
    zHL = jnp.zeros((H, L), f32)
    w_proj = jnp.concatenate([
        jnp.concatenate([p['h2mu_w'].T, zHL, p['h2lv_w'].T, zHL], axis=1),
        jnp.concatenate([zHL, p['c2mu_w'].T, zHL, p['c2lv_w'].T], axis=1),
    ], axis=0)
    b_proj = jnp.concatenate(
        [p['h2mu_b'], p['c2mu_b'], p['h2lv_b'], p['c2lv_b']]).reshape(1, 4 * L)

    # latent2rnn split: block-diag z-part + con-embedding part (zero-padded rows)
    hl_w = p['hl2rnn_w'].T                                        # (L+CE, H)
    cl_w = p['cl2rnn_w'].T
    zLH = jnp.zeros((L, H), f32)
    w_z2rnn = jnp.concatenate([
        jnp.concatenate([hl_w[:L], zLH], axis=1),
        jnp.concatenate([zLH, cl_w[:L]], axis=1),
    ], axis=0)                                                    # (2L, 2H)
    w_ce2rnn = jnp.concatenate([hl_w[L:], cl_w[L:]], axis=1)      # (CE, 2H)
    w_ce2rnn = jnp.concatenate(
        [w_ce2rnn, jnp.zeros((E - CE, 2 * H), f32)], axis=0)      # pad rows -> (E, 2H)
    b_lat = jnp.concatenate([p['hl2rnn_b'], p['cl2rnn_b']]).reshape(1, 2 * H)

    out_w = jnp.concatenate([p['out_w'].T, jnp.zeros((H, 2 * H - V), f32)], axis=1)
    out_b = jnp.concatenate([p['out_b'], jnp.zeros((2 * H - V,), f32)]).reshape(1, 2 * H)

    w64 = jnp.concatenate(
        [w_proj, w_z2rnn, w_ce2rnn, out_w, b_proj, b_lat, out_b], axis=0)
    assert w64.shape == (W64_ROWS, 2 * H)

    return {'embedding': p['embedding'], 'con_embedding': p['con_embedding'],
            'w128': w128, 'w64': w64}


# ------------------------------ model glue ----------------------------------

@partial(jax.jit, static_argnames=('decode_len', 'use_tf'))
def _device_forward(packed, input_seq, input_tense, target_seq, target_tense,
                    input_length, noise_key, decode_len, use_tf):
    B, T = input_seq.shape
    H, E, L, CE, V = _H, _E, _L, _CE, _V

    # sort by input_length descending (pack_padded_sequence requirement)
    order = jnp.argsort(-input_length)
    input_seq = input_seq[order]
    input_tense = input_tense[order]
    target_seq = target_seq[order]
    target_tense = target_tense[order]
    input_length = input_length[order]

    emb = packed['embedding']
    cemb = packed['con_embedding']

    # encoder init hidden == init cell: [zeros(H-CE) | con_embedding(input_tense)]
    con_in = cemb[input_tense]
    h0 = jnp.concatenate([jnp.zeros((B, H - CE), jnp.float32), con_in], axis=-1)

    # time-major embedded encoder inputs, flattened to (T*B, E)
    x_flat = jnp.transpose(emb[input_seq], (1, 0, 2)).reshape(T * B, E)

    # teacher-forcing targets (embedded, time-major, flattened), padded if short
    tw = target_seq.shape[1]
    tgt = target_seq if tw >= decode_len else jnp.pad(
        target_seq, ((0, 0), (0, decode_len - tw)), constant_values=PAD_IDX)
    tgt_flat = jnp.transpose(emb[tgt[:, :decode_len]], (1, 0, 2)).reshape(
        decode_len * B, E)

    # pack_padded_sequence mask: row t*B+b is 1.0 while t < input_length[b]
    valid = (jnp.arange(T)[:, None] < input_length[None, :]).astype(jnp.float32)
    mask_flat = jnp.broadcast_to(valid[:, :, None], (T, B, H)).reshape(T * B, H)

    noise = jax.random.normal(noise_key, (B, 2 * L), jnp.float32)
    con_tgt = cemb[target_tense]
    con_pad = jnp.concatenate([con_tgt, jnp.zeros((B, E - CE), jnp.float32)], axis=-1)

    # single activation slab (width 32): [x | tgt | mask | h0 | noise | con]
    act = jnp.concatenate([x_flat, tgt_flat, mask_flat, h0, noise, con_pad], axis=0)

    out = cvae_fused(act, packed['w128'], packed['w64'],
                     n_t=T, batch=B, decode_len=decode_len, use_tf=use_tf)

    stats = out[:, :4 * L]                               # [h_mu | c_mu | h_lv | c_lv]
    logits = out[:, 4 * L:].reshape(B, decode_len, V).transpose(1, 0, 2)  # (TL, B, V)
    raw_out = logits.reshape(decode_len * B, V)          # torch.vstack layout
    preds = jnp.argmax(logits, axis=-1).T                # (B, TL)
    return order, stats, raw_out, preds


def lstm_cvae_forward(packed, i2w, input_seq, input_tense, target_seq,
                      target_tense, input_length, target_length,
                      mode, iteration, noise_key):
    # Static decode length derived host-side BEFORE any device work (no
    # mid-forward device->host sync).
    decode_len = int(np.max(np.asarray(target_length)))

    if mode == 'train':
        use_tf = random.random() < teacher_forcing_scheduler(iteration)
    else:
        use_tf = False

    order, stats, raw_out, preds = _device_forward(
        packed, input_seq, input_tense, target_seq, target_tense,
        input_length, noise_key, decode_len, use_tf)

    L = LATENT_SIZE
    stats_d = {'mu': stats[:, 0 * L:1 * L], 'logvar': stats[:, 2 * L:3 * L],
               'mu_c': stats[:, 1 * L:2 * L], 'logvar_c': stats[:, 3 * L:4 * L]}

    preds_np = np.asarray(preds)
    target_np = np.asarray(target_seq)[np.asarray(order)]
    str_preds = [idx_ch_arr_to_string(p, i2w, EOW_IDX) for p in preds_np]
    str_tgt = [idx_ch_arr_to_string(t, i2w, EOW_IDX) for t in target_np]
    return raw_out, stats_d, list(zip(str_preds, str_tgt))


if __name__ == "__main__":
    key = jax.random.PRNGKey(0)
    pkey, dkey, nkey = jax.random.split(key, 3)
    params = init_params(pkey)
    packed = pack_params(params)

    specials = ['_', '<', '>']
    letters = list(_string.ascii_lowercase)
    chars = (specials + letters + letters)[:VOCAB_SIZE]
    i2w = {str(i): c for i, c in enumerate(chars)}

    B, T, TL = 2, 8, 8
    k1, k2 = jax.random.split(dkey)
    input_seq = jax.random.randint(k1, (B, T), 3, VOCAB_SIZE, dtype=jnp.int32)
    target_seq = jax.random.randint(k2, (B, TL), 3, VOCAB_SIZE, dtype=jnp.int32)
    input_tense = jnp.array([0, 2], dtype=jnp.int32)
    target_tense = jnp.array([1, 3], dtype=jnp.int32)
    input_length = jnp.array([6, 8], dtype=jnp.int32)
    target_length = jnp.array([TL, TL], dtype=jnp.int32)

    # greedy (test-mode) path
    raw_out, stats, pairs = lstm_cvae_forward(
        packed, i2w, input_seq, input_tense, target_seq, target_tense,
        input_length, target_length, mode='test', iteration=0, noise_key=nkey)
    jax.block_until_ready((raw_out, stats))

    # teacher-forced (train-mode, iteration 0 => scheduler prob == 1) path
    raw_out_tf, stats_tf, pairs_tf = lstm_cvae_forward(
        packed, i2w, input_seq, input_tense, target_seq, target_tense,
        input_length, target_length, mode='train', iteration=0, noise_key=nkey)
    jax.block_until_ready((raw_out_tf, stats_tf))

    assert raw_out.shape == (TL * B, VOCAB_SIZE)
    assert raw_out_tf.shape == (TL * B, VOCAB_SIZE)
    assert stats['mu'].shape == (B, LATENT_SIZE)
    assert stats['logvar_c'].shape == (B, LATENT_SIZE)
    assert len(pairs) == B and len(pairs_tf) == B
    assert np.all(np.isfinite(np.asarray(raw_out)))
    assert np.all(np.isfinite(np.asarray(raw_out_tf)))
    print("KERNEL_OK")
</pallas_src>

<mosaic_0001>
module attributes {stable_mosaic.version = 11 : i64} {
  func.func @cvae_fused_kernel(%arg0: i32, %arg1: memref<54x32xf32, #tpu.memory_space<vmem>>, %arg2: memref<162x128xf32, #tpu.memory_space<vmem>>, %arg3: memref<163x64xf32, #tpu.memory_space<vmem>>, %arg4: memref<2x320xf32, #tpu.memory_space<vmem>>) attributes {dimension_semantics = [#tpu.dimension_semantics<arbitrary>], iteration_bounds = array<i64: 1>, scalar_prefetch = 0 : i64, scratch_operands = 0 : i64, tpu.core_type = #tpu.core_type<tc>, window_params = [{pipeline_mode = #tpu.pipeline_mode<synchronous>, transform_indices = @transform_0, window_bounds = array<i64: 54, 32>}, {pipeline_mode = #tpu.pipeline_mode<synchronous>, transform_indices = @transform_1, window_bounds = array<i64: 162, 128>}, {pipeline_mode = #tpu.pipeline_mode<synchronous>, transform_indices = @transform_2, window_bounds = array<i64: 163, 64>}, {pipeline_mode = #tpu.pipeline_mode<synchronous>, transform_indices = @transform_3, window_bounds = array<i64: 2, 320>}]} {
    %c0 = arith.constant 0 : index
    %c0_0 = arith.constant 0 : index
    %0 = vector.load %arg2[%c0, %c0_0] : memref<162x128xf32, #tpu.memory_space<vmem>>, vector<32x128xf32>
    %c32 = arith.constant 32 : index
    %c0_1 = arith.constant 0 : index
    %1 = vector.load %arg2[%c32, %c0_1] : memref<162x128xf32, #tpu.memory_space<vmem>>, vector<32x128xf32>
    %c64 = arith.constant 64 : index
    %c0_2 = arith.constant 0 : index
    %2 = vector.load %arg2[%c64, %c0_2] : memref<162x128xf32, #tpu.memory_space<vmem>>, vector<32x128xf32>
    %c96 = arith.constant 96 : index
    %c0_3 = arith.constant 0 : index
    %3 = vector.load %arg2[%c96, %c0_3] : memref<162x128xf32, #tpu.memory_space<vmem>>, vector<32x128xf32>
    %c160 = arith.constant 160 : index
    %c0_4 = arith.constant 0 : index
    %4 = vector.load %arg2[%c160, %c0_4] : memref<162x128xf32, #tpu.memory_space<vmem>>, vector<1x128xf32>
    %c0_5 = arith.constant 0 : index
    %c0_6 = arith.constant 0 : index
    %5 = vector.load %arg1[%c0_5, %c0_6] : memref<54x32xf32, #tpu.memory_space<vmem>>, vector<16x32xf32>
    %cst = arith.constant dense<0.000000e+00> : vector<16x128xf32>
    %6 = tpu.matmul %5, %0, %cst {dimension_numbers = #tpu.dot_dimension_numbers<[1], [0], [0], [1], [0, 0, 1, 1], [], []>} : vector<16x32xf32>, vector<32x128xf32>, vector<16x128xf32> -> vector<16x128xf32>
    %7 = vector.broadcast %4 : vector<1x128xf32> to vector<16x128xf32>
    %8 = arith.addf %6, %7 : vector<16x128xf32>
    %c48 = arith.constant 48 : index
    %c0_7 = arith.constant 0 : index
    %9 = vector.load %arg1[%c48, %c0_7] : memref<54x32xf32, #tpu.memory_space<vmem>>, vector<2x32xf32>
    %10 = vector.extract_strided_slice %8 {offsets = [0, 0], sizes = [2, 128], strides = [1, 1]} : vector<16x128xf32> to vector<2x128xf32>
    %cst_8 = arith.constant dense<0.000000e+00> : vector<2x128xf32>
    %11 = tpu.matmul %9, %1, %cst_8 {dimension_numbers = #tpu.dot_dimension_numbers<[1], [0], [0], [1], [0, 0, 1, 1], [], []>} : vector<2x32xf32>, vector<32x128xf32>, vector<2x128xf32> -> vector<2x128xf32>
    %12 = arith.addf %10, %11 : vector<2x128xf32>
    %13 = arith.negf %12 : vector<2x128xf32>
    %14 = math.exp %13 : vector<2x128xf32>
    %cst_9 = arith.constant 1.000000e+00 : f32
    %15 = vector.broadcast %cst_9 : f32 to vector<2x128xf32>
    %16 = arith.addf %15, %14 : vector<2x128xf32>
    %17 = arith.divf %15, %16 : vector<2x128xf32>
    %18 = math.tanh %12 : vector<2x128xf32>
    %19 = vector.extract_strided_slice %17 {offsets = [0, 0], sizes = [2, 32], strides = [1, 1]} : vector<2x128xf32> to vector<2x32xf32>
    %20 = vector.extract_strided_slice %17 {offsets = [0, 32], sizes = [2, 32], strides = [1, 1]} : vector<2x128xf32> to vector<2x32xf32>
    %21 = vector.extract_strided_slice %18 {offsets = [0, 64], sizes = [2, 32], strides = [1, 1]} : vector<2x128xf32> to vector<2x32xf32>
    %22 = vector.extract_strided_slice %17 {offsets = [0, 96], sizes = [2, 32], strides = [1, 1]} : vector<2x128xf32> to vector<2x32xf32>
    %23 = arith.mulf %20, %9 : vector<2x32xf32>
    %24 = arith.mulf %19, %21 : vector<2x32xf32>
    %25 = arith.addf %23, %24 : vector<2x32xf32>
    %26 = math.tanh %25 : vector<2x32xf32>
    %27 = arith.mulf %22, %26 : vector<2x32xf32>
    %c32_10 = arith.constant 32 : index
    %c0_11 = arith.constant 0 : index
    %28 = vector.load %arg1[%c32_10, %c0_11] : memref<54x32xf32, #tpu.memory_space<vmem>>, vector<2x32xf32>
    %cst_12 = arith.constant 0.000000e+00 : f32
    %29 = vector.broadcast %cst_12 : f32 to vector<2x32xf32>
    %30 = arith.cmpf ogt, %28, %29 : vector<2x32xf32>
    %31 = arith.select %30, %27, %9 : vector<2x32xi1>, vector<2x32xf32>
    %cst_13 = arith.constant 0.000000e+00 : f32
    %32 = vector.broadcast %cst_13 : f32 to vector<2x32xf32>
    %33 = arith.cmpf ogt, %28, %32 : vector<2x32xf32>
    %34 = arith.select %33, %25, %9 : vector<2x32xi1>, vector<2x32xf32>
    %35 = vector.extract_strided_slice %8 {offsets = [2, 0], sizes = [2, 128], strides = [1, 1]} : vector<16x128xf32> to vector<2x128xf32>
    %cst_14 = arith.constant dense<0.000000e+00> : vector<2x128xf32>
    %36 = tpu.matmul %31, %1, %cst_14 {dimension_numbers = #tpu.dot_dimension_numbers<[1], [0], [0], [1], [0, 0, 1, 1], [], []>} : vector<2x32xf32>, vector<32x128xf32>, vector<2x128xf32> -> vector<2x128xf32>
    %37 = arith.addf %35, %36 : vector<2x128xf32>
    %38 = arith.negf %37 : vector<2x128xf32>
    %39 = math.exp %38 : vector<2x128xf32>
    %cst_15 = arith.constant 1.000000e+00 : f32
    %40 = vector.broadcast %cst_15 : f32 to vector<2x128xf32>
    %41 = arith.addf %40, %39 : vector<2x128xf32>
    %42 = arith.divf %40, %41 : vector<2x128xf32>
    %43 = math.tanh %37 : vector<2x128xf32>
    %44 = vector.extract_strided_slice %42 {offsets = [0, 0], sizes = [2, 32], strides = [1, 1]} : vector<2x128xf32> to vector<2x32xf32>
    %45 = vector.extract_strided_slice %42 {offsets = [0, 32], sizes = [2, 32], strides = [1, 1]} : vector<2x128xf32> to vector<2x32xf32>
    %46 = vector.extract_strided_slice %43 {offsets = [0, 64], sizes = [2, 32], strides = [1, 1]} : vector<2x128xf32> to vector<2x32xf32>
    %47 = vector.extract_strided_slice %42 {offsets = [0, 96], sizes = [2, 32], strides = [1, 1]} : vector<2x128xf32> to vector<2x32xf32>
    %48 = arith.mulf %45, %34 : vector<2x32xf32>
    %49 = arith.mulf %44, %46 : vector<2x32xf32>
    %50 = arith.addf %48, %49 : vector<2x32xf32>
    %51 = math.tanh %50 : vector<2x32xf32>
    %52 = arith.mulf %47, %51 : vector<2x32xf32>
    %c34 = arith.constant 34 : index
    %c0_16 = arith.constant 0 : index
    %53 = vector.load %arg1[%c34, %c0_16] : memref<54x32xf32, #tpu.memory_space<vmem>>, vector<2x32xf32>
    %cst_17 = arith.constant 0.000000e+00 : f32
    %54 = vector.broadcast %cst_17 : f32 to vector<2x32xf32>
    %55 = arith.cmpf ogt, %53, %54 : vector<2x32xf32>
    %56 = arith.select %55, %52, %31 : vector<2x32xi1>, vector<2x32xf32>
    %cst_18 = arith.constant 0.000000e+00 : f32
    %57 = vector.broadcast %cst_18 : f32 to vector<2x32xf32>
    %58 = arith.cmpf ogt, %53, %57 : vector<2x32xf32>
    %59 = arith.select %58, %50, %34 : vector<2x32xi1>, vector<2x32xf32>
    %60 = vector.extract_strided_slice %8 {offsets = [4, 0], sizes = [2, 128], strides = [1, 1]} : vector<16x128xf32> to vector<2x128xf32>
    %cst_19 = arith.constant dense<0.000000e+00> : vector<2x128xf32>
    %61 = tpu.matmul %56, %1, %cst_19 {dimension_numbers = #tpu.dot_dimension_numbers<[1], [0], [0], [1], [0, 0, 1, 1], [], []>} : vector<2x32xf32>, vector<32x128xf32>, vector<2x128xf32> -> vector<2x128xf32>
    %62 = arith.addf %60, %61 : vector<2x128xf32>
    %63 = arith.negf %62 : vector<2x128xf32>
    %64 = math.exp %63 : vector<2x128xf32>
    %cst_20 = arith.constant 1.000000e+00 : f32
    %65 = vector.broadcast %cst_20 : f32 to vector<2x128xf32>
    %66 = arith.addf %65, %64 : vector<2x128xf32>
    %67 = arith.divf %65, %66 : vector<2x128xf32>
    %68 = math.tanh %62 : vector<2x128xf32>
    %69 = vector.extract_strided_slice %67 {offsets = [0, 0], sizes = [2, 32], strides = [1, 1]} : vector<2x128xf32> to vector<2x32xf32>
    %70 = vector.extract_strided_slice %67 {offsets = [0, 32], sizes = [2, 32], strides = [1, 1]} : vector<2x128xf32> to vector<2x32xf32>
    %71 = vector.extract_strided_slice %68 {offsets = [0, 64], sizes = [2, 32], strides = [1, 1]} : vector<2x128xf32> to vector<2x32xf32>
    %72 = vector.extract_strided_slice %67 {offsets = [0, 96], sizes = [2, 32], strides = [1, 1]} : vector<2x128xf32> to vector<2x32xf32>
    %73 = arith.mulf %70, %59 : vector<2x32xf32>
    %74 = arith.mulf %69, %71 : vector<2x32xf32>
    %75 = arith.addf %73, %74 : vector<2x32xf32>
    %76 = math.tanh %75 : vector<2x32xf32>
    %77 = arith.mulf %72, %76 : vector<2x32xf32>
    %c36 = arith.constant 36 : index
    %c0_21 = arith.constant 0 : index
    %78 = vector.load %arg1[%c36, %c0_21] : memref<54x32xf32, #tpu.memory_space<vmem>>, vector<2x32xf32>
    %cst_22 = arith.constant 0.000000e+00 : f32
    %79 = vector.broadcast %cst_22 : f32 to vector<2x32xf32>
    %80 = arith.cmpf ogt, %78, %79 : vector<2x32xf32>
    %81 = arith.select %80, %77, %56 : vector<2x32xi1>, vector<2x32xf32>
    %cst_23 = arith.constant 0.000000e+00 : f32
    %82 = vector.broadcast %cst_23 : f32 to vector<2x32xf32>
    %83 = arith.cmpf ogt, %78, %82 : vector<2x32xf32>
    %84 = arith.select %83, %75, %59 : vector<2x32xi1>, vector<2x32xf32>
    %85 = vector.extract_strided_slice %8 {offsets = [6, 0], sizes = [2, 128], strides = [1, 1]} : vector<16x128xf32> to vector<2x128xf32>
    %cst_24 = arith.constant dense<0.000000e+00> : vector<2x128xf32>
    %86 = tpu.matmul %81, %1, %cst_24 {dimension_numbers = #tpu.dot_dimension_numbers<[1], [0], [0], [1], [0, 0, 1, 1], [], []>} : vector<2x32xf32>, vector<32x128xf32>, vector<2x128xf32> -> vector<2x128xf32>
    %87 = arith.addf %85, %86 : vector<2x128xf32>
    %88 = arith.negf %87 : vector<2x128xf32>
    %89 = math.exp %88 : vector<2x128xf32>
    %cst_25 = arith.constant 1.000000e+00 : f32
    %90 = vector.broadcast %cst_25 : f32 to vector<2x128xf32>
    %91 = arith.addf %90, %89 : vector<2x128xf32>
    %92 = arith.divf %90, %91 : vector<2x128xf32>
    %93 = math.tanh %87 : vector<2x128xf32>
    %94 = vector.extract_strided_slice %92 {offsets = [0, 0], sizes = [2, 32], strides = [1, 1]} : vector<2x128xf32> to vector<2x32xf32>
    %95 = vector.extract_strided_slice %92 {offsets = [0, 32], sizes = [2, 32], strides = [1, 1]} : vector<2x128xf32> to vector<2x32xf32>
    %96 = vector.extract_strided_slice %93 {offsets = [0, 64], sizes = [2, 32], strides = [1, 1]} : vector<2x128xf32> to vector<2x32xf32>
    %97 = vector.extract_strided_slice %92 {offsets = [0, 96], sizes = [2, 32], strides = [1, 1]} : vector<2x128xf32> to vector<2x32xf32>
    %98 = arith.mulf %95, %84 : vector<2x32xf32>
    %99 = arith.mulf %94, %96 : vector<2x32xf32>
    %100 = arith.addf %98, %99 : vector<2x32xf32>
    %101 = math.tanh %100 : vector<2x32xf32>
    %102 = arith.mulf %97, %101 : vector<2x32xf32>
    %c38 = arith.constant 38 : index
    %c0_26 = arith.constant 0 : index
    %103 = vector.load %arg1[%c38, %c0_26] : memref<54x32xf32, #tpu.memory_space<vmem>>, vector<2x32xf32>
    %cst_27 = arith.constant 0.000000e+00 : f32
    %104 = vector.broadcast %cst_27 : f32 to vector<2x32xf32>
    %105 = arith.cmpf ogt, %103, %104 : vector<2x32xf32>
    %106 = arith.select %105, %102, %81 : vector<2x32xi1>, vector<2x32xf32>
    %cst_28 = arith.constant 0.000000e+00 : f32
    %107 = vector.broadcast %cst_28 : f32 to vector<2x32xf32>
    %108 = arith.cmpf ogt, %103, %107 : vector<2x32xf32>
    %109 = arith.select %108, %100, %84 : vector<2x32xi1>, vector<2x32xf32>
    %110 = vector.extract_strided_slice %8 {offsets = [8, 0], sizes = [2, 128], strides = [1, 1]} : vector<16x128xf32> to vector<2x128xf32>
    %cst_29 = arith.constant dense<0.000000e+00> : vector<2x128xf32>
    %111 = tpu.matmul %106, %1, %cst_29 {dimension_numbers = #tpu.dot_dimension_numbers<[1], [0], [0], [1], [0, 0, 1, 1], [], []>} : vector<2x32xf32>, vector<32x128xf32>, vector<2x128xf32> -> vector<2x128xf32>
    %112 = arith.addf %110, %111 : vector<2x128xf32>
    %113 = arith.negf %112 : vector<2x128xf32>
    %114 = math.exp %113 : vector<2x128xf32>
    %cst_30 = arith.constant 1.000000e+00 : f32
    %115 = vector.broadcast %cst_30 : f32 to vector<2x128xf32>
    %116 = arith.addf %115, %114 : vector<2x128xf32>
    %117 = arith.divf %115, %116 : vector<2x128xf32>
    %118 = math.tanh %112 : vector<2x128xf32>
    %119 = vector.extract_strided_slice %117 {offsets = [0, 0], sizes = [2, 32], strides = [1, 1]} : vector<2x128xf32> to vector<2x32xf32>
    %120 = vector.extract_strided_slice %117 {offsets = [0, 32], sizes = [2, 32], strides = [1, 1]} : vector<2x128xf32> to vector<2x32xf32>
    %121 = vector.extract_strided_slice %118 {offsets = [0, 64], sizes = [2, 32], strides = [1, 1]} : vector<2x128xf32> to vector<2x32xf32>
    %122 = vector.extract_strided_slice %117 {offsets = [0, 96], sizes = [2, 32], strides = [1, 1]} : vector<2x128xf32> to vector<2x32xf32>
    %123 = arith.mulf %120, %109 : vector<2x32xf32>
    %124 = arith.mulf %119, %121 : vector<2x32xf32>
    %125 = arith.addf %123, %124 : vector<2x32xf32>
    %126 = math.tanh %125 : vector<2x32xf32>
    %127 = arith.mulf %122, %126 : vector<2x32xf32>
    %c40 = arith.constant 40 : index
    %c0_31 = arith.constant 0 : index
    %128 = vector.load %arg1[%c40, %c0_31] : memref<54x32xf32, #tpu.memory_space<vmem>>, vector<2x32xf32>
    %cst_32 = arith.constant 0.000000e+00 : f32
    %129 = vector.broadcast %cst_32 : f32 to vector<2x32xf32>
    %130 = arith.cmpf ogt, %128, %129 : vector<2x32xf32>
    %131 = arith.select %130, %127, %106 : vector<2x32xi1>, vector<2x32xf32>
    %cst_33 = arith.constant 0.000000e+00 : f32
    %132 = vector.broadcast %cst_33 : f32 to vector<2x32xf32>
    %133 = arith.cmpf ogt, %128, %132 : vector<2x32xf32>
    %134 = arith.select %133, %125, %109 : vector<2x32xi1>, vector<2x32xf32>
    %135 = vector.extract_strided_slice %8 {offsets = [10, 0], sizes = [2, 128], strides = [1, 1]} : vector<16x128xf32> to vector<2x128xf32>
    %cst_34 = arith.constant dense<0.000000e+00> : vector<2x128xf32>
    %136 = tpu.matmul %131, %1, %cst_34 {dimension_numbers = #tpu.dot_dimension_numbers<[1], [0], [0], [1], [0, 0, 1, 1], [], []>} : vector<2x32xf32>, vector<32x128xf32>, vector<2x128xf32> -> vector<2x128xf32>
    %137 = arith.addf %135, %136 : vector<2x128xf32>
    %138 = arith.negf %137 : vector<2x128xf32>
    %139 = math.exp %138 : vector<2x128xf32>
    %cst_35 = arith.constant 1.000000e+00 : f32
    %140 = vector.broadcast %cst_35 : f32 to vector<2x128xf32>
    %141 = arith.addf %140, %139 : vector<2x128xf32>
    %142 = arith.divf %140, %141 : vector<2x128xf32>
    %143 = math.tanh %137 : vector<2x128xf32>
    %144 = vector.extract_strided_slice %142 {offsets = [0, 0], sizes = [2, 32], strides = [1, 1]} : vector<2x128xf32> to vector<2x32xf32>
    %145 = vector.extract_strided_slice %142 {offsets = [0, 32], sizes = [2, 32], strides = [1, 1]} : vector<2x128xf32> to vector<2x32xf32>
    %146 = vector.extract_strided_slice %143 {offsets = [0, 64], sizes = [2, 32], strides = [1, 1]} : vector<2x128xf32> to vector<2x32xf32>
    %147 = vector.extract_strided_slice %142 {offsets = [0, 96], sizes = [2, 32], strides = [1, 1]} : vector<2x128xf32> to vector<2x32xf32>
    %148 = arith.mulf %145, %134 : vector<2x32xf32>
    %149 = arith.mulf %144, %146 : vector<2x32xf32>
    %150 = arith.addf %148, %149 : vector<2x32xf32>
    %151 = math.tanh %150 : vector<2x32xf32>
    %152 = arith.mulf %147, %151 : vector<2x32xf32>
    %c42 = arith.constant 42 : index
    %c0_36 = arith.constant 0 : index
    %153 = vector.load %arg1[%c42, %c0_36] : memref<54x32xf32, #tpu.memory_space<vmem>>, vector<2x32xf32>
    %cst_37 = arith.constant 0.000000e+00 : f32
    %154 = vector.broadcast %cst_37 : f32 to vector<2x32xf32>
    %155 = arith.cmpf ogt, %153, %154 : vector<2x32xf32>
    %156 = arith.select %155, %152, %131 : vector<2x32xi1>, vector<2x32xf32>
    %cst_38 = arith.constant 0.000000e+00 : f32
    %157 = vector.broadcast %cst_38 : f32 to vector<2x32xf32>
    %158 = arith.cmpf ogt, %153, %157 : vector<2x32xf32>
    %159 = arith.select %158, %150, %134 : vector<2x32xi1>, vector<2x32xf32>
    %160 = vector.extract_strided_slice %8 {offsets = [12, 0], sizes = [2, 128], strides = [1, 1]} : vector<16x128xf32> to vector<2x128xf32>
    %cst_39 = arith.constant dense<0.000000e+00> : vector<2x128xf32>
    %161 = tpu.matmul %156, %1, %cst_39 {dimension_numbers = #tpu.dot_dimension_numbers<[1], [0], [0], [1], [0, 0, 1, 1], [], []>} : vector<2x32xf32>, vector<32x128xf32>, vector<2x128xf32> -> vector<2x128xf32>
    %162 = arith.addf %160, %161 : vector<2x128xf32>
    %163 = arith.negf %162 : vector<2x128xf32>
    %164 = math.exp %163 : vector<2x128xf32>
    %cst_40 = arith.constant 1.000000e+00 : f32
    %165 = vector.broadcast %cst_40 : f32 to vector<2x128xf32>
    %166 = arith.addf %165, %164 : vector<2x128xf32>
    %167 = arith.divf %165, %166 : vector<2x128xf32>
    %168 = math.tanh %162 : vector<2x128xf32>
    %169 = vector.extract_strided_slice %167 {offsets = [0, 0], sizes = [2, 32], strides = [1, 1]} : vector<2x128xf32> to vector<2x32xf32>
    %170 = vector.extract_strided_slice %167 {offsets = [0, 32], sizes = [2, 32], strides = [1, 1]} : vector<2x128xf32> to vector<2x32xf32>
    %171 = vector.extract_strided_slice %168 {offsets = [0, 64], sizes = [2, 32], strides = [1, 1]} : vector<2x128xf32> to vector<2x32xf32>
    %172 = vector.extract_strided_slice %167 {offsets = [0, 96], sizes = [2, 32], strides = [1, 1]} : vector<2x128xf32> to vector<2x32xf32>
    %173 = arith.mulf %170, %159 : vector<2x32xf32>
    %174 = arith.mulf %169, %171 : vector<2x32xf32>
    %175 = arith.addf %173, %174 : vector<2x32xf32>
    %176 = math.tanh %175 : vector<2x32xf32>
    %177 = arith.mulf %172, %176 : vector<2x32xf32>
    %c44 = arith.constant 44 : index
    %c0_41 = arith.constant 0 : index
    %178 = vector.load %arg1[%c44, %c0_41] : memref<54x32xf32, #tpu.memory_space<vmem>>, vector<2x32xf32>
    %cst_42 = arith.constant 0.000000e+00 : f32
    %179 = vector.broadcast %cst_42 : f32 to vector<2x32xf32>
    %180 = arith.cmpf ogt, %178, %179 : vector<2x32xf32>
    %181 = arith.select %180, %177, %156 : vector<2x32xi1>, vector<2x32xf32>
    %cst_43 = arith.constant 0.000000e+00 : f32
    %182 = vector.broadcast %cst_43 : f32 to vector<2x32xf32>
    %183 = arith.cmpf ogt, %178, %182 : vector<2x32xf32>
    %184 = arith.select %183, %175, %159 : vector<2x32xi1>, vector<2x32xf32>
    %185 = vector.extract_strided_slice %8 {offsets = [14, 0], sizes = [2, 128], strides = [1, 1]} : vector<16x128xf32> to vector<2x128xf32>
    %cst_44 = arith.constant dense<0.000000e+00> : vector<2x128xf32>
    %186 = tpu.matmul %181, %1, %cst_44 {dimension_numbers = #tpu.dot_dimension_numbers<[1], [0], [0], [1], [0, 0, 1, 1], [], []>} : vector<2x32xf32>, vector<32x128xf32>, vector<2x128xf32> -> vector<2x128xf32>
    %187 = arith.addf %185, %186 : vector<2x128xf32>
    %188 = arith.negf %187 : vector<2x128xf32>
    %189 = math.exp %188 : vector<2x128xf32>
    %cst_45 = arith.constant 1.000000e+00 : f32
    %190 = vector.broadcast %cst_45 : f32 to vector<2x128xf32>
    %191 = arith.addf %190, %189 : vector<2x128xf32>
    %192 = arith.divf %190, %191 : vector<2x128xf32>
    %193 = math.tanh %187 : vector<2x128xf32>
    %194 = vector.extract_strided_slice %192 {offsets = [0, 0], sizes = [2, 32], strides = [1, 1]} : vector<2x128xf32> to vector<2x32xf32>
    %195 = vector.extract_strided_slice %192 {offsets = [0, 32], sizes = [2, 32], strides = [1, 1]} : vector<2x128xf32> to vector<2x32xf32>
    %196 = vector.extract_strided_slice %193 {offsets = [0, 64], sizes = [2, 32], strides = [1, 1]} : vector<2x128xf32> to vector<2x32xf32>
    %197 = vector.extract_strided_slice %192 {offsets = [0, 96], sizes = [2, 32], strides = [1, 1]} : vector<2x128xf32> to vector<2x32xf32>
    %198 = arith.mulf %195, %184 : vector<2x32xf32>
    %199 = arith.mulf %194, %196 : vector<2x32xf32>
    %200 = arith.addf %198, %199 : vector<2x32xf32>
    %201 = math.tanh %200 : vector<2x32xf32>
    %202 = arith.mulf %197, %201 : vector<2x32xf32>
    %c46 = arith.constant 46 : index
    %c0_46 = arith.constant 0 : index
    %203 = vector.load %arg1[%c46, %c0_46] : memref<54x32xf32, #tpu.memory_space<vmem>>, vector<2x32xf32>
    %cst_47 = arith.constant 0.000000e+00 : f32
    %204 = vector.broadcast %cst_47 : f32 to vector<2x32xf32>
    %205 = arith.cmpf ogt, %203, %204 : vector<2x32xf32>
    %206 = arith.select %205, %202, %181 : vector<2x32xi1>, vector<2x32xf32>
    %cst_48 = arith.constant 0.000000e+00 : f32
    %207 = vector.broadcast %cst_48 : f32 to vector<2x32xf32>
    %208 = arith.cmpf ogt, %203, %207 : vector<2x32xf32>
    %209 = arith.select %208, %200, %184 : vector<2x32xi1>, vector<2x32xf32>
    %c0_49 = arith.constant 0 : index
    %c0_50 = arith.constant 0 : index
    %210 = vector.load %arg3[%c0_49, %c0_50] : memref<163x64xf32, #tpu.memory_space<vmem>>, vector<64x64xf32>
    %c160_51 = arith.constant 160 : index
    %c0_52 = arith.constant 0 : index
    %211 = vector.load %arg3[%c160_51, %c0_52] : memref<163x64xf32, #tpu.memory_space<vmem>>, vector<1x64xf32>
    %212 = tpu.concatenate %206, %209 in 1 : vector<2x32xf32>, vector<2x32xf32> -> vector<2x64xf32>
    %cst_53 = arith.constant dense<0.000000e+00> : vector<2x64xf32>
    %213 = tpu.matmul %212, %210, %cst_53 {dimension_numbers = #tpu.dot_dimension_numbers<[1], [0], [0], [1], [0, 0, 1, 1], [], []>} : vector<2x64xf32>, vector<64x64xf32>, vector<2x64xf32> -> vector<2x64xf32>
    %214 = vector.broadcast %211 : vector<1x64xf32> to vector<2x64xf32>
    %215 = arith.addf %213, %214 : vector<2x64xf32>
    %c50 = arith.constant 50 : index
    %c0_54 = arith.constant 0 : index
    %216 = vector.load %arg1[%c50, %c0_54] : memref<54x32xf32, #tpu.memory_space<vmem>>, vector<2x32xf32>
    %217 = vector.extract_strided_slice %215 {offsets = [0, 0], sizes = [2, 32], strides = [1, 1]} : vector<2x64xf32> to vector<2x32xf32>
    %218 = vector.extract_strided_slice %215 {offsets = [0, 32], sizes = [2, 32], strides = [1, 1]} : vector<2x64xf32> to vector<2x32xf32>
    %cst_55 = arith.constant 5.000000e-01 : f32
    %219 = vector.broadcast %cst_55 : f32 to vector<2x32xf32>
    %220 = arith.mulf %219, %218 : vector<2x32xf32>
    %221 = math.exp %220 : vector<2x32xf32>
    %222 = arith.mulf %216, %221 : vector<2x32xf32>
    %223 = arith.addf %217, %222 : vector<2x32xf32>
    %c64_56 = arith.constant 64 : index
    %c0_57 = arith.constant 0 : index
    %224 = vector.load %arg3[%c64_56, %c0_57] : memref<163x64xf32, #tpu.memory_space<vmem>>, vector<32x64xf32>
    %c96_58 = arith.constant 96 : index
    %c0_59 = arith.constant 0 : index
    %225 = vector.load %arg3[%c96_58, %c0_59] : memref<163x64xf32, #tpu.memory_space<vmem>>, vector<32x64xf32>
    %c161 = arith.constant 161 : index
    %c0_60 = arith.constant 0 : index
    %226 = vector.load %arg3[%c161, %c0_60] : memref<163x64xf32, #tpu.memory_space<vmem>>, vector<1x64xf32>
    %c52 = arith.constant 52 : index
    %c0_61 = arith.constant 0 : index
    %227 = vector.load %arg1[%c52, %c0_61] : memref<54x32xf32, #tpu.memory_space<vmem>>, vector<2x32xf32>
    %cst_62 = arith.constant dense<0.000000e+00> : vector<2x64xf32>
    %228 = tpu.matmul %227, %225, %cst_62 {dimension_numbers = #tpu.dot_dimension_numbers<[1], [0], [0], [1], [0, 0, 1, 1], [], []>} : vector<2x32xf32>, vector<32x64xf32>, vector<2x64xf32> -> vector<2x64xf32>
    %229 = vector.broadcast %226 : vector<1x64xf32> to vector<2x64xf32>
    %230 = arith.addf %228, %229 : vector<2x64xf32>
    %cst_63 = arith.constant dense<0.000000e+00> : vector<2x64xf32>
    %231 = tpu.matmul %223, %224, %cst_63 {dimension_numbers = #tpu.dot_dimension_numbers<[1], [0], [0], [1], [0, 0, 1, 1], [], []>} : vector<2x32xf32>, vector<32x64xf32>, vector<2x64xf32> -> vector<2x64xf32>
    %232 = arith.addf %231, %230 : vector<2x64xf32>
    %233 = vector.extract_strided_slice %232 {offsets = [0, 0], sizes = [2, 32], strides = [1, 1]} : vector<2x64xf32> to vector<2x32xf32>
    %234 = vector.extract_strided_slice %232 {offsets = [0, 32], sizes = [2, 32], strides = [1, 1]} : vector<2x64xf32> to vector<2x32xf32>
    %c128 = arith.constant 128 : index
    %c0_64 = arith.constant 0 : index
    %235 = vector.load %arg3[%c128, %c0_64] : memref<163x64xf32, #tpu.memory_space<vmem>>, vector<32x32xf32>
    %c162 = arith.constant 162 : index
    %c0_65 = arith.constant 0 : index
    %236 = vector.load %arg3[%c162, %c0_65] : memref<163x64xf32, #tpu.memory_space<vmem>>, vector<1x32xf32>
    %237 = vector.shape_cast %236 : vector<1x32xf32> to vector<1x32xf32>
    %238 = vector.broadcast %237 : vector<1x32xf32> to vector<2x32xf32>
    %239 = tpu.iota {dimensions = array<i32: 1>} : vector<2x32xi32>
    %240 = vector.extract_strided_slice %3 {offsets = [1, 0], sizes = [1, 128], strides = [1, 1]} : vector<32x128xf32> to vector<1x128xf32>
    %241 = vector.shape_cast %240 : vector<1x128xf32> to vector<1x128xf32>
    %242 = vector.broadcast %241 : vector<1x128xf32> to vector<2x128xf32>
    %cst_66 = arith.constant dense<0.000000e+00> : vector<2x128xf32>
    %243 = tpu.matmul %233, %2, %cst_66 {dimension_numbers = #tpu.dot_dimension_numbers<[1], [0], [0], [1], [0, 0, 1, 1], [], []>} : vector<2x32xf32>, vector<32x128xf32>, vector<2x128xf32> -> vector<2x128xf32>
    %244 = arith.addf %242, %243 : vector<2x128xf32>
    %245 = arith.negf %244 : vector<2x128xf32>
    %246 = math.exp %245 : vector<2x128xf32>
    %cst_67 = arith.constant 1.000000e+00 : f32
    %247 = vector.broadcast %cst_67 : f32 to vector<2x128xf32>
    %248 = arith.addf %247, %246 : vector<2x128xf32>
    %249 = arith.divf %247, %248 : vector<2x128xf32>
    %250 = math.tanh %244 : vector<2x128xf32>
    %251 = vector.extract_strided_slice %249 {offsets = [0, 0], sizes = [2, 32], strides = [1, 1]} : vector<2x128xf32> to vector<2x32xf32>
    %252 = vector.extract_strided_slice %249 {offsets = [0, 32], sizes = [2, 32], strides = [1, 1]} : vector<2x128xf32> to vector<2x32xf32>
    %253 = vector.extract_strided_slice %250 {offsets = [0, 64], sizes = [2, 32], strides = [1, 1]} : vector<2x128xf32> to vector<2x32xf32>
    %254 = vector.extract_strided_slice %249 {offsets = [0, 96], sizes = [2, 32], strides = [1, 1]} : vector<2x128xf32> to vector<2x32xf32>
    %255 = arith.mulf %252, %234 : vector<2x32xf32>
    %256 = arith.mulf %251, %253 : vector<2x32xf32>
    %257 = arith.addf %255, %256 : vector<2x32xf32>
    %258 = math.tanh %257 : vector<2x32xf32>
    %259 = arith.mulf %254, %258 : vector<2x32xf32>
    %cst_68 = arith.constant dense<0.000000e+00> : vector<2x32xf32>
    %260 = tpu.matmul %259, %235, %cst_68 {dimension_numbers = #tpu.dot_dimension_numbers<[1], [0], [0], [1], [0, 0, 1, 1], [], []>} : vector<2x32xf32>, vector<32x32xf32>, vector<2x32xf32> -> vector<2x32xf32>
    %261 = arith.addf %260, %238 : vector<2x32xf32>
    %262 = tpu.bitcast %261 : vector<2x32xf32> -> vector<2x32xi32>
    %c0_i32 = arith.constant 0 : i32
    %263 = vector.broadcast %c0_i32 : i32 to vector<2x32xi32>
    %264 = arith.cmpi slt, %262, %263 : vector<2x32xi32>
    %c2147483647_i32 = arith.constant 2147483647 : i32
    %265 = vector.broadcast %c2147483647_i32 : i32 to vector<2x32xi32>
    %266 = arith.xori %262, %265 : vector<2x32xi32>
    %267 = arith.select %264, %266, %262 : vector<2x32xi1>, vector<2x32xi32>
    %c-32_i32 = arith.constant -32 : i32
    %268 = vector.broadcast %c-32_i32 : i32 to vector<2x32xi32>
    %269 = arith.andi %267, %268 : vector<2x32xi32>
    %c31_i32 = arith.constant 31 : i32
    %270 = vector.broadcast %c31_i32 : i32 to vector<2x32xi32>
    %271 = arith.subi %270, %239 : vector<2x32xi32>
    %272 = arith.ori %269, %271 : vector<2x32xi32>
    %cst_69 = arith.constant dense<-2147483648> : vector<2xi32>
    %273 = vector.multi_reduction <maxsi>, %272, %cst_69 [1] : vector<2x32xi32> to vector<2xi32>
    %274 = vector.shape_cast %273 : vector<2xi32> to vector<2x1xi32>
    %275 = vector.broadcast %274 : vector<2x1xi32> to vector<2x32xi32>
    %276 = arith.cmpi eq, %272, %275 : vector<2x32xi32>
    %277 = arith.extui %276 : vector<2x32xi1> to vector<2x32xi32>
    %278 = arith.sitofp %277 : vector<2x32xi32> to vector<2x32xf32>
    %cst_70 = arith.constant dense<0.000000e+00> : vector<2x128xf32>
    %279 = tpu.matmul %278, %3, %cst_70 {dimension_numbers = #tpu.dot_dimension_numbers<[1], [0], [0], [1], [0, 0, 1, 1], [], []>} : vector<2x32xf32>, vector<32x128xf32>, vector<2x128xf32> -> vector<2x128xf32>
    %cst_71 = arith.constant dense<0.000000e+00> : vector<2x128xf32>
    %280 = tpu.matmul %259, %2, %cst_71 {dimension_numbers = #tpu.dot_dimension_numbers<[1], [0], [0], [1], [0, 0, 1, 1], [], []>} : vector<2x32xf32>, vector<32x128xf32>, vector<2x128xf32> -> vector<2x128xf32>
    %281 = arith.addf %279, %280 : vector<2x128xf32>
    %282 = arith.negf %281 : vector<2x128xf32>
    %283 = math.exp %282 : vector<2x128xf32>
    %cst_72 = arith.constant 1.000000e+00 : f32
    %284 = vector.broadcast %cst_72 : f32 to vector<2x128xf32>
    %285 = arith.addf %284, %283 : vector<2x128xf32>
    %286 = arith.divf %284, %285 : vector<2x128xf32>
    %287 = math.tanh %281 : vector<2x128xf32>
    %288 = vector.extract_strided_slice %286 {offsets = [0, 0], sizes = [2, 32], strides = [1, 1]} : vector<2x128xf32> to vector<2x32xf32>
    %289 = vector.extract_strided_slice %286 {offsets = [0, 32], sizes = [2, 32], strides = [1, 1]} : vector<2x128xf32> to vector<2x32xf32>
    %290 = vector.extract_strided_slice %287 {offsets = [0, 64], sizes = [2, 32], strides = [1, 1]} : vector<2x128xf32> to vector<2x32xf32>
    %291 = vector.extract_strided_slice %286 {offsets = [0, 96], sizes = [2, 32], strides = [1, 1]} : vector<2x128xf32> to vector<2x32xf32>
    %292 = arith.mulf %289, %257 : vector<2x32xf32>
    %293 = arith.mulf %288, %290 : vector<2x32xf32>
    %294 = arith.addf %292, %293 : vector<2x32xf32>
    %295 = math.tanh %294 : vector<2x32xf32>
    %296 = arith.mulf %291, %295 : vector<2x32xf32>
    %cst_73 = arith.constant dense<0.000000e+00> : vector<2x32xf32>
    %297 = tpu.matmul %296, %235, %cst_73 {dimension_numbers = #tpu.dot_dimension_numbers<[1], [0], [0], [1], [0, 0, 1, 1], [], []>} : vector<2x32xf32>, vector<32x32xf32>, vector<2x32xf32> -> vector<2x32xf32>
    %298 = arith.addf %297, %238 : vector<2x32xf32>
    %299 = tpu.bitcast %298 : vector<2x32xf32> -> vector<2x32xi32>
    %c0_i32_74 = arith.constant 0 : i32
    %300 = vector.broadcast %c0_i32_74 : i32 to vector<2x32xi32>
    %301 = arith.cmpi slt, %299, %300 : vector<2x32xi32>
    %c2147483647_i32_75 = arith.constant 2147483647 : i32
    %302 = vector.broadcast %c2147483647_i32_75 : i32 to vector<2x32xi32>
    %303 = arith.xori %299, %302 : vector<2x32xi32>
    %304 = arith.select %301, %303, %299 : vector<2x32xi1>, vector<2x32xi32>
    %c-32_i32_76 = arith.constant -32 : i32
    %305 = vector.broadcast %c-32_i32_76 : i32 to vector<2x32xi32>
    %306 = arith.andi %304, %305 : vector<2x32xi32>
    %c31_i32_77 = arith.constant 31 : i32
    %307 = vector.broadcast %c31_i32_77 : i32 to vector<2x32xi32>
    %308 = arith.subi %307, %239 : vector<2x32xi32>
    %309 = arith.ori %306, %308 : vector<2x32xi32>
    %cst_78 = arith.constant dense<-2147483648> : vector<2xi32>
    %310 = vector.multi_reduction <maxsi>, %309, %cst_78 [1] : vector<2x32xi32> to vector<2xi32>
    %311 = vector.shape_cast %310 : vector<2xi32> to vector<2x1xi32>
    %312 = vector.broadcast %311 : vector<2x1xi32> to vector<2x32xi32>
    %313 = arith.cmpi eq, %309, %312 : vector<2x32xi32>
    %314 = arith.extui %313 : vector<2x32xi1> to vector<2x32xi32>
    %315 = arith.sitofp %314 : vector<2x32xi32> to vector<2x32xf32>
    %cst_79 = arith.constant dense<0.000000e+00> : vector<2x128xf32>
    %316 = tpu.matmul %315, %3, %cst_79 {dimension_numbers = #tpu.dot_dimension_numbers<[1], [0], [0], [1], [0, 0, 1, 1], [], []>} : vector<2x32xf32>, vector<32x128xf32>, vector<2x128xf32> -> vector<2x128xf32>
    %cst_80 = arith.constant dense<0.000000e+00> : vector<2x128xf32>
    %317 = tpu.matmul %296, %2, %cst_80 {dimension_numbers = #tpu.dot_dimension_numbers<[1], [0], [0], [1], [0, 0, 1, 1], [], []>} : vector<2x32xf32>, vector<32x128xf32>, vector<2x128xf32> -> vector<2x128xf32>
    %318 = arith.addf %316, %317 : vector<2x128xf32>
    %319 = arith.negf %318 : vector<2x128xf32>
    %320 = math.exp %319 : vector<2x128xf32>
    %cst_81 = arith.constant 1.000000e+00 : f32
    %321 = vector.broadcast %cst_81 : f32 to vector<2x128xf32>
    %322 = arith.addf %321, %320 : vector<2x128xf32>
    %323 = arith.divf %321, %322 : vector<2x128xf32>
    %324 = math.tanh %318 : vector<2x128xf32>
    %325 = vector.extract_strided_slice %323 {offsets = [0, 0], sizes = [2, 32], strides = [1, 1]} : vector<2x128xf32> to vector<2x32xf32>
    %326 = vector.extract_strided_slice %323 {offsets = [0, 32], sizes = [2, 32], strides = [1, 1]} : vector<2x128xf32> to vector<2x32xf32>
    %327 = vector.extract_strided_slice %324 {offsets = [0, 64], sizes = [2, 32], strides = [1, 1]} : vector<2x128xf32> to vector<2x32xf32>
    %328 = vector.extract_strided_slice %323 {offsets = [0, 96], sizes = [2, 32], strides = [1, 1]} : vector<2x128xf32> to vector<2x32xf32>
    %329 = arith.mulf %326, %294 : vector<2x32xf32>
    %330 = arith.mulf %325, %327 : vector<2x32xf32>
    %331 = arith.addf %329, %330 : vector<2x32xf32>
    %332 = math.tanh %331 : vector<2x32xf32>
    %333 = arith.mulf %328, %332 : vector<2x32xf32>
    %cst_82 = arith.constant dense<0.000000e+00> : vector<2x32xf32>
    %334 = tpu.matmul %333, %235, %cst_82 {dimension_numbers = #tpu.dot_dimension_numbers<[1], [0], [0], [1], [0, 0, 1, 1], [], []>} : vector<2x32xf32>, vector<32x32xf32>, vector<2x32xf32> -> vector<2x32xf32>
    %335 = arith.addf %334, %238 : vector<2x32xf32>
    %336 = tpu.bitcast %335 : vector<2x32xf32> -> vector<2x32xi32>
    %c0_i32_83 = arith.constant 0 : i32
    %337 = vector.broadcast %c0_i32_83 : i32 to vector<2x32xi32>
    %338 = arith.cmpi slt, %336, %337 : vector<2x32xi32>
    %c2147483647_i32_84 = arith.constant 2147483647 : i32
    %339 = vector.broadcast %c2147483647_i32_84 : i32 to vector<2x32xi32>
    %340 = arith.xori %336, %339 : vector<2x32xi32>
    %341 = arith.select %338, %340, %336 : vector<2x32xi1>, vector<2x32xi32>
    %c-32_i32_85 = arith.constant -32 : i32
    %342 = vector.broadcast %c-32_i32_85 : i32 to vector<2x32xi32>
    %343 = arith.andi %341, %342 : vector<2x32xi32>
    %c31_i32_86 = arith.constant 31 : i32
    %344 = vector.broadcast %c31_i32_86 : i32 to vector<2x32xi32>
    %345 = arith.subi %344, %239 : vector<2x32xi32>
    %346 = arith.ori %343, %345 : vector<2x32xi32>
    %cst_87 = arith.constant dense<-2147483648> : vector<2xi32>
    %347 = vector.multi_reduction <maxsi>, %346, %cst_87 [1] : vector<2x32xi32> to vector<2xi32>
    %348 = vector.shape_cast %347 : vector<2xi32> to vector<2x1xi32>
    %349 = vector.broadcast %348 : vector<2x1xi32> to vector<2x32xi32>
    %350 = arith.cmpi eq, %346, %349 : vector<2x32xi32>
    %351 = arith.extui %350 : vector<2x32xi1> to vector<2x32xi32>
    %352 = arith.sitofp %351 : vector<2x32xi32> to vector<2x32xf32>
    %cst_88 = arith.constant dense<0.000000e+00> : vector<2x128xf32>
    %353 = tpu.matmul %352, %3, %cst_88 {dimension_numbers = #tpu.dot_dimension_numbers<[1], [0], [0], [1], [0, 0, 1, 1], [], []>} : vector<2x32xf32>, vector<32x128xf32>, vector<2x128xf32> -> vector<2x128xf32>
    %cst_89 = arith.constant dense<0.000000e+00> : vector<2x128xf32>
    %354 = tpu.matmul %333, %2, %cst_89 {dimension_numbers = #tpu.dot_dimension_numbers<[1], [0], [0], [1], [0, 0, 1, 1], [], []>} : vector<2x32xf32>, vector<32x128xf32>, vector<2x128xf32> -> vector<2x128xf32>
    %355 = arith.addf %353, %354 : vector<2x128xf32>
    %356 = arith.negf %355 : vector<2x128xf32>
    %357 = math.exp %356 : vector<2x128xf32>
    %cst_90 = arith.constant 1.000000e+00 : f32
    %358 = vector.broadcast %cst_90 : f32 to vector<2x128xf32>
    %359 = arith.addf %358, %357 : vector<2x128xf32>
    %360 = arith.divf %358, %359 : vector<2x128xf32>
    %361 = math.tanh %355 : vector<2x128xf32>
    %362 = vector.extract_strided_slice %360 {offsets = [0, 0], sizes = [2, 32], strides = [1, 1]} : vector<2x128xf32> to vector<2x32xf32>
    %363 = vector.extract_strided_slice %360 {offsets = [0, 32], sizes = [2, 32], strides = [1, 1]} : vector<2x128xf32> to vector<2x32xf32>
    %364 = vector.extract_strided_slice %361 {offsets = [0, 64], sizes = [2, 32], strides = [1, 1]} : vector<2x128xf32> to vector<2x32xf32>
    %365 = vector.extract_strided_slice %360 {offsets = [0, 96], sizes = [2, 32], strides = [1, 1]} : vector<2x128xf32> to vector<2x32xf32>
    %366 = arith.mulf %363, %331 : vector<2x32xf32>
    %367 = arith.mulf %362, %364 : vector<2x32xf32>
    %368 = arith.addf %366, %367 : vector<2x32xf32>
    %369 = math.tanh %368 : vector<2x32xf32>
    %370 = arith.mulf %365, %369 : vector<2x32xf32>
    %cst_91 = arith.constant dense<0.000000e+00> : vector<2x32xf32>
    %371 = tpu.matmul %370, %235, %cst_91 {dimension_numbers = #tpu.dot_dimension_numbers<[1], [0], [0], [1], [0, 0, 1, 1], [], []>} : vector<2x32xf32>, vector<32x32xf32>, vector<2x32xf32> -> vector<2x32xf32>
    %372 = arith.addf %371, %238 : vector<2x32xf32>
    %373 = tpu.bitcast %372 : vector<2x32xf32> -> vector<2x32xi32>
    %c0_i32_92 = arith.constant 0 : i32
    %374 = vector.broadcast %c0_i32_92 : i32 to vector<2x32xi32>
    %375 = arith.cmpi slt, %373, %374 : vector<2x32xi32>
    %c2147483647_i32_93 = arith.constant 2147483647 : i32
    %376 = vector.broadcast %c2147483647_i32_93 : i32 to vector<2x32xi32>
    %377 = arith.xori %373, %376 : vector<2x32xi32>
    %378 = arith.select %375, %377, %373 : vector<2x32xi1>, vector<2x32xi32>
    %c-32_i32_94 = arith.constant -32 : i32
    %379 = vector.broadcast %c-32_i32_94 : i32 to vector<2x32xi32>
    %380 = arith.andi %378, %379 : vector<2x32xi32>
    %c31_i32_95 = arith.constant 31 : i32
    %381 = vector.broadcast %c31_i32_95 : i32 to vector<2x32xi32>
    %382 = arith.subi %381, %239 : vector<2x32xi32>
    %383 = arith.ori %380, %382 : vector<2x32xi32>
    %cst_96 = arith.constant dense<-2147483648> : vector<2xi32>
    %384 = vector.multi_reduction <maxsi>, %383, %cst_96 [1] : vector<2x32xi32> to vector<2xi32>
    %385 = vector.shape_cast %384 : vector<2xi32> to vector<2x1xi32>
    %386 = vector.broadcast %385 : vector<2x1xi32> to vector<2x32xi32>
    %387 = arith.cmpi eq, %383, %386 : vector<2x32xi32>
    %388 = arith.extui %387 : vector<2x32xi1> to vector<2x32xi32>
    %389 = arith.sitofp %388 : vector<2x32xi32> to vector<2x32xf32>
    %cst_97 = arith.constant dense<0.000000e+00> : vector<2x128xf32>
    %390 = tpu.matmul %389, %3, %cst_97 {dimension_numbers = #tpu.dot_dimension_numbers<[1], [0], [0], [1], [0, 0, 1, 1], [], []>} : vector<2x32xf32>, vector<32x128xf32>, vector<2x128xf32> -> vector<2x128xf32>
    %cst_98 = arith.constant dense<0.000000e+00> : vector<2x128xf32>
    %391 = tpu.matmul %370, %2, %cst_98 {dimension_numbers = #tpu.dot_dimension_numbers<[1], [0], [0], [1], [0, 0, 1, 1], [], []>} : vector<2x32xf32>, vector<32x128xf32>, vector<2x128xf32> -> vector<2x128xf32>
    %392 = arith.addf %390, %391 : vector<2x128xf32>
    %393 = arith.negf %392 : vector<2x128xf32>
    %394 = math.exp %393 : vector<2x128xf32>
    %cst_99 = arith.constant 1.000000e+00 : f32
    %395 = vector.broadcast %cst_99 : f32 to vector<2x128xf32>
    %396 = arith.addf %395, %394 : vector<2x128xf32>
    %397 = arith.divf %395, %396 : vector<2x128xf32>
    %398 = math.tanh %392 : vector<2x128xf32>
    %399 = vector.extract_strided_slice %397 {offsets = [0, 0], sizes = [2, 32], strides = [1, 1]} : vector<2x128xf32> to vector<2x32xf32>
    %400 = vector.extract_strided_slice %397 {offsets = [0, 32], sizes = [2, 32], strides = [1, 1]} : vector<2x128xf32> to vector<2x32xf32>
    %401 = vector.extract_strided_slice %398 {offsets = [0, 64], sizes = [2, 32], strides = [1, 1]} : vector<2x128xf32> to vector<2x32xf32>
    %402 = vector.extract_strided_slice %397 {offsets = [0, 96], sizes = [2, 32], strides = [1, 1]} : vector<2x128xf32> to vector<2x32xf32>
    %403 = arith.mulf %400, %368 : vector<2x32xf32>
    %404 = arith.mulf %399, %401 : vector<2x32xf32>
    %405 = arith.addf %403, %404 : vector<2x32xf32>
    %406 = math.tanh %405 : vector<2x32xf32>
    %407 = arith.mulf %402, %406 : vector<2x32xf32>
    %cst_100 = arith.constant dense<0.000000e+00> : vector<2x32xf32>
    %408 = tpu.matmul %407, %235, %cst_100 {dimension_numbers = #tpu.dot_dimension_numbers<[1], [0], [0], [1], [0, 0, 1, 1], [], []>} : vector<2x32xf32>, vector<32x32xf32>, vector<2x32xf32> -> vector<2x32xf32>
    %409 = arith.addf %408, %238 : vector<2x32xf32>
    %410 = tpu.bitcast %409 : vector<2x32xf32> -> vector<2x32xi32>
    %c0_i32_101 = arith.constant 0 : i32
    %411 = vector.broadcast %c0_i32_101 : i32 to vector<2x32xi32>
    %412 = arith.cmpi slt, %410, %411 : vector<2x32xi32>
    %c2147483647_i32_102 = arith.constant 2147483647 : i32
    %413 = vector.broadcast %c2147483647_i32_102 : i32 to vector<2x32xi32>
    %414 = arith.xori %410, %413 : vector<2x32xi32>
    %415 = arith.select %412, %414, %410 : vector<2x32xi1>, vector<2x32xi32>
    %c-32_i32_103 = arith.constant -32 : i32
    %416 = vector.broadcast %c-32_i32_103 : i32 to vector<2x32xi32>
    %417 = arith.andi %415, %416 : vector<2x32xi32>
    %c31_i32_104 = arith.constant 31 : i32
    %418 = vector.broadcast %c31_i32_104 : i32 to vector<2x32xi32>
    %419 = arith.subi %418, %239 : vector<2x32xi32>
    %420 = arith.ori %417, %419 : vector<2x32xi32>
    %cst_105 = arith.constant dense<-2147483648> : vector<2xi32>
    %421 = vector.multi_reduction <maxsi>, %420, %cst_105 [1] : vector<2x32xi32> to vector<2xi32>
    %422 = vector.shape_cast %421 : vector<2xi32> to vector<2x1xi32>
    %423 = vector.broadcast %422 : vector<2x1xi32> to vector<2x32xi32>
    %424 = arith.cmpi eq, %420, %423 : vector<2x32xi32>
    %425 = arith.extui %424 : vector<2x32xi1> to vector<2x32xi32>
    %426 = arith.sitofp %425 : vector<2x32xi32> to vector<2x32xf32>
    %cst_106 = arith.constant dense<0.000000e+00> : vector<2x128xf32>
    %427 = tpu.matmul %426, %3, %cst_106 {dimension_numbers = #tpu.dot_dimension_numbers<[1], [0], [0], [1], [0, 0, 1, 1], [], []>} : vector<2x32xf32>, vector<32x128xf32>, vector<2x128xf32> -> vector<2x128xf32>
    %cst_107 = arith.constant dense<0.000000e+00> : vector<2x128xf32>
    %428 = tpu.matmul %407, %2, %cst_107 {dimension_numbers = #tpu.dot_dimension_numbers<[1], [0], [0], [1], [0, 0, 1, 1], [], []>} : vector<2x32xf32>, vector<32x128xf32>, vector<2x128xf32> -> vector<2x128xf32>
    %429 = arith.addf %427, %428 : vector<2x128xf32>
    %430 = arith.negf %429 : vector<2x128xf32>
    %431 = math.exp %430 : vector<2x128xf32>
    %cst_108 = arith.constant 1.000000e+00 : f32
    %432 = vector.broadcast %cst_108 : f32 to vector<2x128xf32>
    %433 = arith.addf %432, %431 : vector<2x128xf32>
    %434 = arith.divf %432, %433 : vector<2x128xf32>
    %435 = math.tanh %429 : vector<2x128xf32>
    %436 = vector.extract_strided_slice %434 {offsets = [0, 0], sizes = [2, 32], strides = [1, 1]} : vector<2x128xf32> to vector<2x32xf32>
    %437 = vector.extract_strided_slice %434 {offsets = [0, 32], sizes = [2, 32], strides = [1, 1]} : vector<2x128xf32> to vector<2x32xf32>
    %438 = vector.extract_strided_slice %435 {offsets = [0, 64], sizes = [2, 32], strides = [1, 1]} : vector<2x128xf32> to vector<2x32xf32>
    %439 = vector.extract_strided_slice %434 {offsets = [0, 96], sizes = [2, 32], strides = [1, 1]} : vector<2x128xf32> to vector<2x32xf32>
    %440 = arith.mulf %437, %405 : vector<2x32xf32>
    %441 = arith.mulf %436, %438 : vector<2x32xf32>
    %442 = arith.addf %440, %441 : vector<2x32xf32>
    %443 = math.tanh %442 : vector<2x32xf32>
    %444 = arith.mulf %439, %443 : vector<2x32xf32>
    %cst_109 = arith.constant dense<0.000000e+00> : vector<2x32xf32>
    %445 = tpu.matmul %444, %235, %cst_109 {dimension_numbers = #tpu.dot_dimension_numbers<[1], [0], [0], [1], [0, 0, 1, 1], [], []>} : vector<2x32xf32>, vector<32x32xf32>, vector<2x32xf32> -> vector<2x32xf32>
    %446 = arith.addf %445, %238 : vector<2x32xf32>
    %447 = tpu.bitcast %446 : vector<2x32xf32> -> vector<2x32xi32>
    %c0_i32_110 = arith.constant 0 : i32
    %448 = vector.broadcast %c0_i32_110 : i32 to vector<2x32xi32>
    %449 = arith.cmpi slt, %447, %448 : vector<2x32xi32>
    %c2147483647_i32_111 = arith.constant 2147483647 : i32
    %450 = vector.broadcast %c2147483647_i32_111 : i32 to vector<2x32xi32>
    %451 = arith.xori %447, %450 : vector<2x32xi32>
    %452 = arith.select %449, %451, %447 : vector<2x32xi1>, vector<2x32xi32>
    %c-32_i32_112 = arith.constant -32 : i32
    %453 = vector.broadcast %c-32_i32_112 : i32 to vector<2x32xi32>
    %454 = arith.andi %452, %453 : vector<2x32xi32>
    %c31_i32_113 = arith.constant 31 : i32
    %455 = vector.broadcast %c31_i32_113 : i32 to vector<2x32xi32>
    %456 = arith.subi %455, %239 : vector<2x32xi32>
    %457 = arith.ori %454, %456 : vector<2x32xi32>
    %cst_114 = arith.constant dense<-2147483648> : vector<2xi32>
    %458 = vector.multi_reduction <maxsi>, %457, %cst_114 [1] : vector<2x32xi32> to vector<2xi32>
    %459 = vector.shape_cast %458 : vector<2xi32> to vector<2x1xi32>
    %460 = vector.broadcast %459 : vector<2x1xi32> to vector<2x32xi32>
    %461 = arith.cmpi eq, %457, %460 : vector<2x32xi32>
    %462 = arith.extui %461 : vector<2x32xi1> to vector<2x32xi32>
    %463 = arith.sitofp %462 : vector<2x32xi32> to vector<2x32xf32>
    %cst_115 = arith.constant dense<0.000000e+00> : vector<2x128xf32>
    %464 = tpu.matmul %463, %3, %cst_115 {dimension_numbers = #tpu.dot_dimension_numbers<[1], [0], [0], [1], [0, 0, 1, 1], [], []>} : vector<2x32xf32>, vector<32x128xf32>, vector<2x128xf32> -> vector<2x128xf32>
    %cst_116 = arith.constant dense<0.000000e+00> : vector<2x128xf32>
    %465 = tpu.matmul %444, %2, %cst_116 {dimension_numbers = #tpu.dot_dimension_numbers<[1], [0], [0], [1], [0, 0, 1, 1], [], []>} : vector<2x32xf32>, vector<32x128xf32>, vector<2x128xf32> -> vector<2x128xf32>
    %466 = arith.addf %464, %465 : vector<2x128xf32>
    %467 = arith.negf %466 : vector<2x128xf32>
    %468 = math.exp %467 : vector<2x128xf32>
    %cst_117 = arith.constant 1.000000e+00 : f32
    %469 = vector.broadcast %cst_117 : f32 to vector<2x128xf32>
    %470 = arith.addf %469, %468 : vector<2x128xf32>
    %471 = arith.divf %469, %470 : vector<2x128xf32>
    %472 = math.tanh %466 : vector<2x128xf32>
    %473 = vector.extract_strided_slice %471 {offsets = [0, 0], sizes = [2, 32], strides = [1, 1]} : vector<2x128xf32> to vector<2x32xf32>
    %474 = vector.extract_strided_slice %471 {offsets = [0, 32], sizes = [2, 32], strides = [1, 1]} : vector<2x128xf32> to vector<2x32xf32>
    %475 = vector.extract_strided_slice %472 {offsets = [0, 64], sizes = [2, 32], strides = [1, 1]} : vector<2x128xf32> to vector<2x32xf32>
    %476 = vector.extract_strided_slice %471 {offsets = [0, 96], sizes = [2, 32], strides = [1, 1]} : vector<2x128xf32> to vector<2x32xf32>
    %477 = arith.mulf %474, %442 : vector<2x32xf32>
    %478 = arith.mulf %473, %475 : vector<2x32xf32>
    %479 = arith.addf %477, %478 : vector<2x32xf32>
    %480 = math.tanh %479 : vector<2x32xf32>
    %481 = arith.mulf %476, %480 : vector<2x32xf32>
    %cst_118 = arith.constant dense<0.000000e+00> : vector<2x32xf32>
    %482 = tpu.matmul %481, %235, %cst_118 {dimension_numbers = #tpu.dot_dimension_numbers<[1], [0], [0], [1], [0, 0, 1, 1], [], []>} : vector<2x32xf32>, vector<32x32xf32>, vector<2x32xf32> -> vector<2x32xf32>
    %483 = arith.addf %482, %238 : vector<2x32xf32>
    %484 = tpu.bitcast %483 : vector<2x32xf32> -> vector<2x32xi32>
    %c0_i32_119 = arith.constant 0 : i32
    %485 = vector.broadcast %c0_i32_119 : i32 to vector<2x32xi32>
    %486 = arith.cmpi slt, %484, %485 : vector<2x32xi32>
    %c2147483647_i32_120 = arith.constant 2147483647 : i32
    %487 = vector.broadcast %c2147483647_i32_120 : i32 to vector<2x32xi32>
    %488 = arith.xori %484, %487 : vector<2x32xi32>
    %489 = arith.select %486, %488, %484 : vector<2x32xi1>, vector<2x32xi32>
    %c-32_i32_121 = arith.constant -32 : i32
    %490 = vector.broadcast %c-32_i32_121 : i32 to vector<2x32xi32>
    %491 = arith.andi %489, %490 : vector<2x32xi32>
    %c31_i32_122 = arith.constant 31 : i32
    %492 = vector.broadcast %c31_i32_122 : i32 to vector<2x32xi32>
    %493 = arith.subi %492, %239 : vector<2x32xi32>
    %494 = arith.ori %491, %493 : vector<2x32xi32>
    %cst_123 = arith.constant dense<-2147483648> : vector<2xi32>
    %495 = vector.multi_reduction <maxsi>, %494, %cst_123 [1] : vector<2x32xi32> to vector<2xi32>
    %496 = vector.shape_cast %495 : vector<2xi32> to vector<2x1xi32>
    %497 = vector.broadcast %496 : vector<2x1xi32> to vector<2x32xi32>
    %498 = arith.cmpi eq, %494, %497 : vector<2x32xi32>
    %499 = arith.extui %498 : vector<2x32xi1> to vector<2x32xi32>
    %500 = arith.sitofp %499 : vector<2x32xi32> to vector<2x32xf32>
    %cst_124 = arith.constant dense<0.000000e+00> : vector<2x128xf32>
    %501 = tpu.matmul %500, %3, %cst_124 {dimension_numbers = #tpu.dot_dimension_numbers<[1], [0], [0], [1], [0, 0, 1, 1], [], []>} : vector<2x32xf32>, vector<32x128xf32>, vector<2x128xf32> -> vector<2x128xf32>
    %cst_125 = arith.constant dense<0.000000e+00> : vector<2x128xf32>
    %502 = tpu.matmul %481, %2, %cst_125 {dimension_numbers = #tpu.dot_dimension_numbers<[1], [0], [0], [1], [0, 0, 1, 1], [], []>} : vector<2x32xf32>, vector<32x128xf32>, vector<2x128xf32> -> vector<2x128xf32>
    %503 = arith.addf %501, %502 : vector<2x128xf32>
    %504 = arith.negf %503 : vector<2x128xf32>
    %505 = math.exp %504 : vector<2x128xf32>
    %cst_126 = arith.constant 1.000000e+00 : f32
    %506 = vector.broadcast %cst_126 : f32 to vector<2x128xf32>
    %507 = arith.addf %506, %505 : vector<2x128xf32>
    %508 = arith.divf %506, %507 : vector<2x128xf32>
    %509 = math.tanh %503 : vector<2x128xf32>
    %510 = vector.extract_strided_slice %508 {offsets = [0, 0], sizes = [2, 32], strides = [1, 1]} : vector<2x128xf32> to vector<2x32xf32>
    %511 = vector.extract_strided_slice %508 {offsets = [0, 32], sizes = [2, 32], strides = [1, 1]} : vector<2x128xf32> to vector<2x32xf32>
    %512 = vector.extract_strided_slice %509 {offsets = [0, 64], sizes = [2, 32], strides = [1, 1]} : vector<2x128xf32> to vector<2x32xf32>
    %513 = vector.extract_strided_slice %508 {offsets = [0, 96], sizes = [2, 32], strides = [1, 1]} : vector<2x128xf32> to vector<2x32xf32>
    %514 = arith.mulf %511, %479 : vector<2x32xf32>
    %515 = arith.mulf %510, %512 : vector<2x32xf32>
    %516 = arith.addf %514, %515 : vector<2x32xf32>
    %517 = math.tanh %516 : vector<2x32xf32>
    %518 = arith.mulf %513, %517 : vector<2x32xf32>
    %cst_127 = arith.constant dense<0.000000e+00> : vector<2x32xf32>
    %519 = tpu.matmul %518, %235, %cst_127 {dimension_numbers = #tpu.dot_dimension_numbers<[1], [0], [0], [1], [0, 0, 1, 1], [], []>} : vector<2x32xf32>, vector<32x32xf32>, vector<2x32xf32> -> vector<2x32xf32>
    %520 = arith.addf %519, %238 : vector<2x32xf32>
    %521 = tpu.concatenate %215, %261, %298, %335, %372, %409, %446, %483, %520 in 1 : vector<2x64xf32>, vector<2x32xf32>, vector<2x32xf32>, vector<2x32xf32>, vector<2x32xf32>, vector<2x32xf32>, vector<2x32xf32>, vector<2x32xf32>, vector<2x32xf32> -> vector<2x320xf32>
    %c0_128 = arith.constant 0 : index
    %c0_129 = arith.constant 0 : index
    %522 = vector.load %arg4[%c0_128, %c0_129] : memref<2x320xf32, #tpu.memory_space<vmem>>, vector<2x320xf32>
    tpu.vector_store %arg4[%c0_128, %c0_129], %521 {strides = array<i32>} : memref<2x320xf32, #tpu.memory_space<vmem>>, vector<2x320xf32>,
    return
  }
  func.func @transform_0(%arg0: i32) -> (i32, i32) {
    %c0_i32 = arith.constant 0 : i32
    %c0_i32_0 = arith.constant 0 : i32
    %c0_i32_1 = arith.constant 0 : i32
    return %c0_i32, %c0_i32_0 : i32, i32
  }
  func.func @transform_1(%arg0: i32) -> (i32, i32) {
    %c0_i32 = arith.constant 0 : i32
    %c0_i32_0 = arith.constant 0 : i32
    %c0_i32_1 = arith.constant 0 : i32
    return %c0_i32, %c0_i32_0 : i32, i32
  }
  func.func @transform_2(%arg0: i32) -> (i32, i32) {
    %c0_i32 = arith.constant 0 : i32
    %c0_i32_0 = arith.constant 0 : i32
    %c0_i32_1 = arith.constant 0 : i32
    return %c0_i32, %c0_i32_0 : i32, i32
  }
  func.func @transform_3(%arg0: i32) -> (i32, i32) {
    %c0_i32 = arith.constant 0 : i32
    %c0_i32_0 = arith.constant 0 : i32
    %c0_i32_1 = arith.constant 0 : i32
    return %c0_i32, %c0_i32_0 : i32, i32
  }
}

</mosaic_0001>

<bundles_post_ra>
// kernel: neg.1
= control target key start
LH: loop header
LB: loop body
LE: loop exit
PB: predicated region body
PF: predicated region fallthrough
CT: control target
= control target key end

     0   :  { %s24_s0 = inlined_call_operand.vmem [shape: s32[2], index: 0, kind: input, shape index: {}]   ;;  %s25_s1 = inlined_call_operand.vmem [shape: s32[2], index: 1, kind: output, shape index: {}]  }
   0x1   :  { %v2_v0 = vld [vmem:[%s24_s0] sm:$0x1] }
   0x2   :  { %v5_v1 = vsub.s32 0, %v2_v0 }
   0x4   :  { %7 = vst [vmem:[%s25_s1] sm:$0x1] %v5_v1 }

// kernel: _device_forward.1
= control target key start
LH: loop header
LB: loop body
LE: loop exit
PB: predicated region body
PF: predicated region fallthrough
CT: control target
= control target key end

     0   :  { %v4219_v2 = vmov 0.0   ;;  %vm4220_vm0 = vmmov 0   ;;  %vm37_vm1 = vcmask 261120   ;;  %s4221_s9 = smov 64   ;;  %s4222_s10 = smov 32   ;;  %vm1085_vm10 = vcmask 523264   ;;  %s5057_s1 = inlined_call_operand.vmem [shape: f32[162,128], index: 1, kind: input, shape index: {}]   ;;  %s5058_s0 = inlined_call_operand.vmem [shape: f32[54,32], index: 0, kind: input, shape index: {}]   ;;  %s5059_s2 = inlined_call_operand.vmem [shape: f32[163,64], index: 2, kind: input, shape index: {}]   ;;  %s5060_s3 = inlined_call_operand.vmem [shape: f32[2,320], index: 3, kind: output, shape index: {}]  }
   0x1   :  { %v17_v0 = vld [vmem:[%s5057_s1 + $0x18] sm:$0xff]  ;;  %v16_v1 = vld [vmem:[%s5057_s1 + $0x10] sm:$0xff]  ;;  %3691 = vmatprep.subr.mxu1 %v4219_v2  ;;  %3699 = vmatprep.mubr.msk.f32.mxu1 %vm4220_vm0, %v4219_v2  ;;  %v15_v5 = vld [vmem:[%s5057_s1 + $0x8] sm:$0xff]  ;;  %s4223_s11 = smov 96   ;;  %vm1524_vm12 = vcmask 254976  }
   0x2   :  { %v4255_v3 = vld [vmem:[%s5057_s1 + $0x38] sm:$0xff]  ;;  %3680 = vmatprep.subr.mxu0 %v17_v0  ;;  %v4263_v4 = vld [vmem:[%s5057_s1 + $0x30] sm:$0xff]  ;;  %v31_v6 = vld [vmem:[%s5058_s0] sm:$0xff] }
   0x3   :  { %3692 = vmatpush3.msra.mxu1 %v4255_v3  ;;  %3681 = vmatpush3.msra.mxu0 %v17_v0  ;;  %v4276_v7 = vld [vmem:[%s5057_s1 + $0x28] sm:$0xff]  ;;  %v14_v8 = vld [vmem:[%s5057_s1] sm:$0xff]  ;;  %v4295_v11 = vld [vmem:[%s5058_s0 + $0x30] sm:$0x3] }
   0x4   :  { %3693 = vmatprep.subr.mxu1 %v4219_v2  ;;  %3682 = vmatprep.subr.mxu0 %v16_v1  ;;  %v4286_v9 = vld [vmem:[%s5057_s1 + $0x20] sm:$0xff]  ;;  %v32_v10 = vld [vmem:[%s5058_s0 + $0x8] sm:$0xff] }
   0x5   :  { %3694 = vmatpush3.msra.mxu1 %v4263_v4  ;;  %3683 = vmatpush3.msra.mxu0 %v16_v1  ;;  %v3437_v12 = vld [vmem:[%s5057_s1 + $0xa0] ss:$0 sm:$0xff]  ;;  %v339_v57 = vld [vmem:[%s5058_s0 + $0x22] sm:$0x3] }
   0x6   :  { %3695 = vmatprep.subr.mxu1 %v4219_v2  ;;  %3684 = vmatprep.subr.mxu0 %v15_v5  ;;  %v221_v32 = vld [vmem:[%s5058_s0 + $0x20] sm:$0x3]  ;;  %vm340_vm3 = vcmp.gt.f32.partialorder %v339_v57, 0.0 }
   0x7   :  { %3688 = vmatprep.mubr.msk.f32.mxu0 %vm37_vm1, %v31_v6  ;;  %3685 = vmatpush3.msra.mxu0 %v15_v5  ;;  %vm222_vm2 = vcmp.gt.f32.partialorder %v221_v32, 0.0 }
   0x8   :  { %3696 = vmatpush3.msra.mxu1 %v4276_v7  ;;  %3686 = vmatprep.subr.mxu0 %v14_v8 }
   0x9   :  { %3697 = vmatprep.subr.mxu1 %v4219_v2  ;;  %3687 = vmatpush3.msra.mxu0 %v14_v8 }
   0xa   :  { %3698 = vmatpush3.msra.mxu1 %v4286_v9  ;;  %3689 = vmatmul.mubr.msk.f32.vlgmr.msra.gmra.mxu0 %vm37_vm1, %v32_v10 }
   0xb   :  { %3700 = vmatmul.mubr.msk.f32.vlgmr.msra.gmra.mxu1 %vm37_vm1, %v4295_v11  ;;  %3702 = vmatprep.subr.mxu0 %v4219_v2 }
   0xc   :  { %3710 = vmatprep.mubr.msk.f32.mxu0 %vm4220_vm0, %v4219_v2  ;;  %3703 = vmatpush3.msra.mxu0 %v4255_v3 }
   0xd   :  { %3713 = vmatprep.subr.mxu1 %v4219_v2  ;;  %3704 = vmatprep.subr.mxu0 %v4219_v2 }
   0xe   :  { %3714 = vmatpush3.msra.mxu1 %v4255_v3  ;;  %3705 = vmatpush3.msra.mxu0 %v4263_v4 }
   0xf   :  { %3715 = vmatprep.subr.mxu1 %v4219_v2  ;;  %3706 = vmatprep.subr.mxu0 %v4219_v2 }
  0x10   :  { %3716 = vmatpush3.msra.mxu1 %v4263_v4  ;;  %3707 = vmatpush3.msra.mxu0 %v4276_v7 }
  0x11   :  { %3717 = vmatprep.subr.mxu1 %v4219_v2  ;;  %3708 = vmatprep.subr.mxu0 %v4219_v2 }
  0x12   :  { %3718 = vmatpush3.msra.mxu1 %v4276_v7  ;;  %3709 = vmatpush3.msra.mxu0 %v4286_v9 }
  0x13   :  { %3719 = vmatprep.subr.mxu1 %v4219_v2  ;;  %3721 = vmatprep.mubr.msk.f32.mxu1 %vm4220_vm0, %v4219_v2 }
  0x14   :  { %3720 = vmatpush3.msra.mxu1 %v4286_v9  ;;  %3724 = vmatprep.subr.mxu0 %v4219_v2 }
  0x15   :  { %3735 = vmatprep.subr.mxu1 %v4219_v2 }
  0xca   :  { %v3690_v13 = vpop.f32.mrf.mxu0 }
  0xcb   :  { %v189_v14 = vpop.f32.mrf.mxu1  ;;  %v4327_v15 = vadd.f32 %v3690_v13, %v3437_v12 }
  0xcc   :  { %v110_v16 = vpop.f32.mrf.mxu0 }
  0xcd   :  { %v3701_v17 = vpop.f32.mrf.mxu1  ;;  %v4329_v18 = vadd.f32 %v3437_v12, %v110_v16 }
  0xcf   :  { %v193_v19 = vadd.f32 %v189_v14, %v4329_v18 }
  0xd1   :  { %4079 = vtanh.f32 %v193_v19  ;;  %v3441_v21 = vmul.f32 -1.442695, %v193_v19 }
  0xd3   :  { %4081 = vpow2.f32 %v3441_v21 }
  0xde   :  { %v4080_v20 = vpop.eup %4079 }
  0xdf   :  { %206 = vrot.lane.b32.xlu0 %v4080_v20, %s4221_s9 }
  0xe0   :  { %v4082_v22 = vpop.eup %4081 }
  0xe1   :  { %v197_v23 = vadd.f32 1.0, %v4082_v22 }
  0xe3   :  { %201 = vrot.lane.b32.xlu0 %v4295_v11, %s4222_s10  ;;  %4083 = vrcp.f32 %v197_v23 }
  0xf0   :  { %v4084_v24 = vpop.eup %4083 }
 0x151   :  { %v207_v25 = vpop.permute.xlu0 %206 }
 0x152   :  { %v209_v26 = vmul.f32 %v4084_v24, %v207_v25 }
 0x154   :  { %211 = vrot.lane.b32.xlu1 %v209_v26, %s4222_s10  ;;  %v459_v26 = vld [vmem:[%s5058_s0 + $0x24] sm:$0x3] }
 0x155   :  { %v202_v27 = vpop.permute.xlu0 %201  ;;  %vm460_vm4 = vcmp.gt.f32.partialorder %v459_v26, 0.0 }
 0x156   :  { %v204_v28 = vmul.f32 %v4084_v24, %v202_v27 }
 0x1c6   :  { %v212_v29 = vpop.permute.xlu1 %211 }
 0x1c7   :  { %v214_v30 = vadd.f32 %v212_v29, %v204_v28 }
 0x1c9   :  { %4085 = vtanh.f32 %v214_v30 }
 0x1d6   :  { %v4086_v31 = vpop.eup %4085 }
 0x1d7   :  { %217 = vrot.lane.b32.xlu1 %v4086_v31, %s4221_s9 }
 0x1db   :  { %229 = vrot.lane.b32.xlu1 %v214_v30, %s4223_s11 }
 0x249   :  { %v218_v33 = vpop.permute.xlu1 %217 }
 0x24a   :  { %v220_v34 = vmul.f32 %v4084_v24, %v218_v33 }
 0x24c   :  { %224 = vrot.lane.b32.xlu0 %v220_v34, %s4222_s10 }
 0x24d   :  { %v230_v35 = vpop.permute.xlu1 %229 }
 0x24e   :  { %v232_v36 = vsel %vm222_vm2, %v230_v35, %v4295_v11 }
 0x24f   :  { %v318_v37 = vrot.slane %v232_v36, 6 }
 0x251   :  { %319 = vrot.lane.b32.xlu1 %v318_v37, %s4222_s10 }
 0x2be   :  { %v225_v38 = vpop.permute.xlu0 %224 }
 0x2bf   :  { %v227_v39 = vsel %vm222_vm2, %v225_v38, %v4295_v11 }
 0x2c0   :  { %3711 = vmatmul.mubr.msk.f32.vlgmr.msra.gmra.mxu0 %vm37_vm1, %v227_v39 }
 0x2c1   :  { %3725 = vmatpush3.msra.mxu0 %v4255_v3  ;;  %3732 = vmatprep.mubr.msk.f32.mxu0 %vm4220_vm0, %v4219_v2 }
 0x2c2   :  { %3726 = vmatprep.subr.mxu0 %v4219_v2 }
 0x2c3   :  { %3727 = vmatpush3.msra.mxu0 %v4263_v4  ;;  %v320_v51 = vpop.permute.xlu1 %319 }
 0x2c4   :  { %3728 = vmatprep.subr.mxu0 %v4219_v2 }
 0x2c5   :  { %3729 = vmatpush3.msra.mxu0 %v4276_v7 }
 0x2c6   :  { %3730 = vmatprep.subr.mxu0 %v4219_v2 }
 0x2c7   :  { %3731 = vmatpush3.msra.mxu0 %v4286_v9 }
 0x2c8   :  { %3746 = vmatprep.subr.mxu0 %v4219_v2 }
 0x380   :  { %v302_v40 = vpop.f32.mrf.mxu0 }
 0x381   :  { %v307_v41 = vrot.slane %v302_v40, 6 }
 0x382   :  { %v3712_v42 = vpop.f32.mrf.mxu0 }
 0x383   :  { %v309_v43 = vadd.f32 %v307_v41, %v4329_v18 }
 0x385   :  { %4087 = vtanh.f32 %v309_v43  ;;  %v3443_v45 = vmul.f32 -1.442695, %v309_v43 }
 0x387   :  { %4089 = vpow2.f32 %v3443_v45 }
 0x392   :  { %v4088_v44 = vpop.eup %4087 }
 0x393   :  { %324 = vrot.lane.b32.xlu0 %v4088_v44, %s4221_s9 }
 0x394   :  { %v4090_v46 = vpop.eup %4089 }
 0x395   :  { %v313_v47 = vadd.f32 1.0, %v4090_v46 }
 0x397   :  { %4091 = vrcp.f32 %v313_v47 }
 0x3a4   :  { %v4092_v48 = vpop.eup %4091 }
 0x3a5   :  { %v322_v52 = vmul.f32 %v4092_v48, %v320_v51  ;;  %v579_v51 = vld [vmem:[%s5058_s0 + $0x26] sm:$0x3] }
 0x3a6   :  { %vm580_vm5 = vcmp.gt.f32.partialorder %v579_v51, 0.0 }
 0x405   :  { %v325_v49 = vpop.permute.xlu0 %324 }
 0x406   :  { %v327_v50 = vmul.f32 %v4092_v48, %v325_v49 }
 0x408   :  { %329 = vrot.lane.b32.xlu0 %v327_v50, %s4222_s10 }
 0x47a   :  { %v330_v53 = vpop.permute.xlu0 %329 }
 0x47b   :  { %v332_v54 = vadd.f32 %v330_v53, %v322_v52 }
 0x47d   :  { %4093 = vtanh.f32 %v332_v54  ;;  %v348_v56 = vrot.slane %v332_v54, 2 }
 0x48a   :  { %v4094_v55 = vpop.eup %4093 }
 0x48b   :  { %335 = vrot.lane.b32.xlu1 %v4094_v55, %s4221_s9 }
 0x48f   :  { %349 = vrot.lane.b32.xlu1 %v348_v56, %s4223_s11 }
 0x4fd   :  { %v336_v58 = vpop.permute.xlu1 %335 }
 0x4fe   :  { %v338_v59 = vmul.f32 %v4092_v48, %v336_v58 }
 0x500   :  { %v342_v60 = vrot.slane %v338_v59, 2 }
 0x501   :  { %v350_v61 = vpop.permute.xlu1 %349 }
 0x502   :  { %v352_v62 = vsel %vm340_vm3, %v350_v61, %v232_v36  ;;  %343 = vrot.lane.b32.xlu0 %v342_v60, %s4222_s10 }
 0x503   :  { %v438_v63 = vrot.slane %v352_v62, 4 }
 0x505   :  { %439 = vrot.lane.b32.xlu1 %v438_v63, %s4222_s10 }
 0x574   :  { %v344_v0 = vpop.permute.xlu0 %343 }
 0x575   :  { %v346_v1 = vsel %vm340_vm3, %v344_v0, %v227_v39 }
 0x576   :  { %3722 = vmatmul.mubr.msk.f32.vlgmr.msra.gmra.mxu1 %vm37_vm1, %v346_v1 }
 0x577   :  { %3736 = vmatpush3.msra.mxu1 %v4255_v3  ;;  %3743 = vmatprep.mubr.msk.f32.mxu1 %vm4220_vm0, %v4219_v2  ;;  %v440_v20 = vpop.permute.xlu1 %439 }
 0x578   :  { %3737 = vmatprep.subr.mxu1 %v4219_v2 }
 0x579   :  { %3738 = vmatpush3.msra.mxu1 %v4263_v4 }
 0x57a   :  { %3739 = vmatprep.subr.mxu1 %v4219_v2 }
 0x57b   :  { %3740 = vmatpush3.msra.mxu1 %v4276_v7 }
 0x57c   :  { %3741 = vmatprep.subr.mxu1 %v4219_v2 }
 0x57d   :  { %3742 = vmatpush3.msra.mxu1 %v4286_v9 }
 0x57e   :  { %3757 = vmatprep.subr.mxu1 %v4219_v2 }
 0x636   :  { %v422_v5 = vpop.f32.mrf.mxu1 }
 0x637   :  { %v427_v6 = vrot.slane %v422_v5, 4 }
 0x638   :  { %v3723_v8 = vpop.f32.mrf.mxu1 }
 0x639   :  { %v429_v10 = vadd.f32 %v427_v6, %v4329_v18 }
 0x63b   :  { %4095 = vtanh.f32 %v429_v10  ;;  %v3445_v12 = vmul.f32 -1.442695, %v429_v10 }
 0x63d   :  { %4097 = vpow2.f32 %v3445_v12 }
 0x648   :  { %v4096_v11 = vpop.eup %4095 }
 0x649   :  { %444 = vrot.lane.b32.xlu0 %v4096_v11, %s4221_s9 }
 0x64a   :  { %v4098_v13 = vpop.eup %4097 }
 0x64b   :  { %v433_v14 = vadd.f32 1.0, %v4098_v13 }
 0x64d   :  { %4099 = vrcp.f32 %v433_v14 }
 0x65a   :  { %v4100_v16 = vpop.eup %4099 }
 0x65b   :  { %v442_v21 = vmul.f32 %v4100_v16, %v440_v20 }
 0x6bb   :  { %v445_v17 = vpop.permute.xlu0 %444 }
 0x6bc   :  { %v447_v19 = vmul.f32 %v4100_v16, %v445_v17 }
 0x6be   :  { %449 = vrot.lane.b32.xlu0 %v447_v19, %s4222_s10 }
 0x730   :  { %v450_v22 = vpop.permute.xlu0 %449 }
 0x731   :  { %v452_v23 = vadd.f32 %v450_v22, %v442_v21 }
 0x733   :  { %4101 = vtanh.f32 %v452_v23  ;;  %v468_v25 = vrot.slane %v452_v23, 4 }
 0x740   :  { %v4102_v24 = vpop.eup %4101 }
 0x741   :  { %455 = vrot.lane.b32.xlu1 %v4102_v24, %s4221_s9 }
 0x745   :  { %469 = vrot.lane.b32.xlu1 %v468_v25, %s4223_s11 }
 0x7b3   :  { %v456_v27 = vpop.permute.xlu1 %455 }
 0x7b4   :  { %v458_v28 = vmul.f32 %v4100_v16, %v456_v27  ;;  %v695_v16 = vld [vmem:[%s5058_s0 + $0x28] sm:$0x3] }
 0x7b5   :  { %vm696_vm6 = vcmp.gt.f32.partialorder %v695_v16, 0.0 }
 0x7b6   :  { %v462_v29 = vrot.slane %v458_v28, 4 }
 0x7b7   :  { %v470_v30 = vpop.permute.xlu1 %469 }
 0x7b8   :  { %v472_v31 = vsel %vm460_vm4, %v470_v30, %v352_v62  ;;  %463 = vrot.lane.b32.xlu0 %v462_v29, %s4222_s10 }
 0x7b9   :  { %v558_v32 = vrot.slane %v472_v31, 2 }
 0x7bb   :  { %559 = vrot.lane.b32.xlu1 %v558_v32, %s4222_s10 }
 0x82a   :  { %v464_v33 = vpop.permute.xlu0 %463 }
 0x82b   :  { %v466_v34 = vsel %vm460_vm4, %v464_v33, %v346_v1 }
 0x82c   :  { %3733 = vmatmul.mubr.msk.f32.vlgmr.msra.gmra.mxu0 %vm37_vm1, %v466_v34 }
 0x82d   :  { %3747 = vmatpush3.msra.mxu0 %v4255_v3  ;;  %3754 = vmatprep.mubr.msk.f32.mxu0 %vm4220_vm0, %v4219_v2  ;;  %v560_v46 = vpop.permute.xlu1 %559 }
 0x82e   :  { %3748 = vmatprep.subr.mxu0 %v4219_v2 }
 0x82f   :  { %3749 = vmatpush3.msra.mxu0 %v4263_v4 }
 0x830   :  { %3750 = vmatprep.subr.mxu0 %v4219_v2 }
 0x831   :  { %3751 = vmatpush3.msra.mxu0 %v4276_v7 }
 0x832   :  { %3752 = vmatprep.subr.mxu0 %v4219_v2 }
 0x833   :  { %3753 = vmatpush3.msra.mxu0 %v4286_v9 }
 0x834   :  { %3768 = vmatprep.subr.mxu0 %v4219_v2 }
 0x8ec   :  { %v542_v35 = vpop.f32.mrf.mxu0 }
 0x8ed   :  { %v547_v36 = vrot.slane %v542_v35, 2 }
 0x8ee   :  { %v3734_v37 = vpop.f32.mrf.mxu0 }
 0x8ef   :  { %v549_v38 = vadd.f32 %v547_v36, %v4329_v18 }
 0x8f1   :  { %4103 = vtanh.f32 %v549_v38  ;;  %v3447_v40 = vmul.f32 -1.442695, %v549_v38  ;;  %v813_v38 = vld [vmem:[%s5058_s0 + $0x2a] sm:$0x3] }
 0x8f2   :  { %vm814_vm7 = vcmp.gt.f32.partialorder %v813_v38, 0.0 }
 0x8f3   :  { %4105 = vpow2.f32 %v3447_v40 }
 0x8fe   :  { %v4104_v39 = vpop.eup %4103 }
 0x8ff   :  { %564 = vrot.lane.b32.xlu0 %v4104_v39, %s4221_s9 }
 0x900   :  { %v4106_v41 = vpop.eup %4105 }
 0x901   :  { %v553_v42 = vadd.f32 1.0, %v4106_v41 }
 0x903   :  { %4107 = vrcp.f32 %v553_v42 }
 0x910   :  { %v4108_v43 = vpop.eup %4107 }
 0x911   :  { %v562_v47 = vmul.f32 %v4108_v43, %v560_v46 }
 0x971   :  { %v565_v44 = vpop.permute.xlu0 %564 }
 0x972   :  { %v567_v45 = vmul.f32 %v4108_v43, %v565_v44 }
 0x974   :  { %569 = vrot.lane.b32.xlu0 %v567_v45, %s4222_s10 }
 0x9e6   :  { %v570_v48 = vpop.permute.xlu0 %569 }
 0x9e7   :  { %v572_v49 = vadd.f32 %v570_v48, %v562_v47 }
 0x9e9   :  { %4109 = vtanh.f32 %v572_v49  ;;  %v588_v50 = vrot.slane %v572_v49, 6 }
 0x9f6   :  { %v4110_v18 = vpop.eup %4109 }
 0x9f7   :  { %575 = vrot.lane.b32.xlu1 %v4110_v18, %s4221_s9 }
 0x9fb   :  { %589 = vrot.lane.b32.xlu1 %v588_v50, %s4223_s11 }
 0xa69   :  { %v576_v52 = vpop.permute.xlu1 %575 }
 0xa6a   :  { %v578_v53 = vmul.f32 %v4108_v43, %v576_v52 }
 0xa6c   :  { %v582_v54 = vrot.slane %v578_v53, 6 }
 0xa6d   :  { %v590_v55 = vpop.permute.xlu1 %589 }
 0xa6e   :  { %583 = vrot.lane.b32.xlu0 %v582_v54, %s4222_s10  ;;  %v592_v56 = vsel %vm580_vm5, %v590_v55, %v472_v31 }
 0xa6f   :  { %675 = vrot.lane.b32.xlu1 %v592_v56, %s4222_s10 }
 0xae0   :  { %v584_v57 = vpop.permute.xlu0 %583 }
 0xae1   :  { %v586_v58 = vsel %vm580_vm5, %v584_v57, %v466_v34  ;;  %v676_v10 = vpop.permute.xlu1 %675 }
 0xae2   :  { %3744 = vmatmul.mubr.msk.f32.vlgmr.msra.gmra.mxu1 %vm37_vm1, %v586_v58 }
 0xae3   :  { %3758 = vmatpush3.msra.mxu1 %v4255_v3  ;;  %3765 = vmatprep.mubr.msk.f32.mxu1 %vm4220_vm0, %v4219_v2 }
 0xae4   :  { %3759 = vmatprep.subr.mxu1 %v4219_v2 }
 0xae5   :  { %3760 = vmatpush3.msra.mxu1 %v4263_v4 }
 0xae6   :  { %3761 = vmatprep.subr.mxu1 %v4219_v2 }
 0xae7   :  { %3762 = vmatpush3.msra.mxu1 %v4276_v7 }
 0xae8   :  { %3763 = vmatprep.subr.mxu1 %v4219_v2 }
 0xae9   :  { %3764 = vmatpush3.msra.mxu1 %v4286_v9 }
 0xaea   :  { %3779 = vmatprep.subr.mxu1 %v4219_v2 }
 0xba2   :  { %v662_v59 = vpop.f32.mrf.mxu1 }
 0xba3   :  { %v666_v60 = vadd.f32 %v662_v59, %v4327_v15 }
 0xba4   :  { %v3745_v61 = vpop.f32.mrf.mxu1 }
 0xba5   :  { %4111 = vtanh.f32 %v666_v60  ;;  %v3449_v63 = vmul.f32 -1.442695, %v666_v60 }
 0xba7   :  { %4113 = vpow2.f32 %v3449_v63  ;;  %v933_v63 = vld [vmem:[%s5058_s0 + $0x2c] sm:$0x3] }
 0xba8   :  { %vm934_vm8 = vcmp.gt.f32.partialorder %v933_v63, 0.0 }
 0xbb2   :  { %v4112_v62 = vpop.eup %4111 }
 0xbb3   :  { %680 = vrot.lane.b32.xlu0 %v4112_v62, %s4221_s9 }
 0xbb4   :  { %v4114_v0 = vpop.eup %4113 }
 0xbb5   :  { %v670_v1 = vadd.f32 1.0, %v4114_v0 }
 0xbb7   :  { %4115 = vrcp.f32 %v670_v1 }
 0xbc4   :  { %v4116_v5 = vpop.eup %4115 }
 0xbc5   :  { %v678_v11 = vmul.f32 %v4116_v5, %v676_v10 }
 0xc25   :  { %v681_v6 = vpop.permute.xlu0 %680 }
 0xc26   :  { %v683_v8 = vmul.f32 %v4116_v5, %v681_v6 }
 0xc28   :  { %685 = vrot.lane.b32.xlu0 %v683_v8, %s4222_s10 }
 0xc9a   :  { %v686_v12 = vpop.permute.xlu0 %685 }
 0xc9b   :  { %v688_v13 = vadd.f32 %v686_v12, %v678_v11 }
 0xc9d   :  { %4117 = vtanh.f32 %v688_v13 }
 0xcaa   :  { %v4118_v14 = vpop.eup %4117 }
 0xcab   :  { %691 = vrot.lane.b32.xlu1 %v4118_v14, %s4221_s9 }
 0xcaf   :  { %703 = vrot.lane.b32.xlu1 %v688_v13, %s4223_s11 }
 0xd1d   :  { %v692_v17 = vpop.permute.xlu1 %691 }
 0xd1e   :  { %v694_v19 = vmul.f32 %v4116_v5, %v692_v17 }
 0xd20   :  { %698 = vrot.lane.b32.xlu0 %v694_v19, %s4222_s10 }
 0xd21   :  { %v704_v20 = vpop.permute.xlu1 %703 }
 0xd22   :  { %v706_v21 = vsel %vm696_vm6, %v704_v20, %v592_v56 }
 0xd23   :  { %v792_v22 = vrot.slane %v706_v21, 6 }
 0xd25   :  { %793 = vrot.lane.b32.xlu1 %v792_v22, %s4222_s10 }
 0xd92   :  { %v699_v23 = vpop.permute.xlu0 %698 }
 0xd93   :  { %v701_v24 = vsel %vm696_vm6, %v699_v23, %v586_v58 }
 0xd94   :  { %3755 = vmatmul.mubr.msk.f32.vlgmr.msra.gmra.mxu0 %vm37_vm1, %v701_v24 }
 0xd95   :  { %3769 = vmatpush3.msra.mxu0 %v4255_v3  ;;  %3776 = vmatprep.mubr.msk.f32.mxu0 %vm4220_vm0, %v4219_v2 }
 0xd96   :  { %3770 = vmatprep.subr.mxu0 %v4219_v2 }
 0xd97   :  { %3771 = vmatpush3.msra.mxu0 %v4263_v4 }
 0xd98   :  { %3772 = vmatprep.subr.mxu0 %v4219_v2 }
 0xd99   :  { %3773 = vmatpush3.msra.mxu0 %v4276_v7 }
 0xd9a   :  { %3774 = vmatprep.subr.mxu0 %v4219_v2 }
 0xd9b   :  { %3775 = vmatpush3.msra.mxu0 %v4286_v9  ;;  %v794_v9 = vpop.permute.xlu1 %793 }
 0xd9c   :  { %3798 = vmatprep.subr.mxu0 %v4219_v2 }
 0xe54   :  { %v776_v25 = vpop.f32.mrf.mxu0 }
 0xe55   :  { %v781_v26 = vrot.slane %v776_v25, 6 }
 0xe56   :  { %v3756_v3 = vpop.f32.mrf.mxu0 }
 0xe57   :  { %v783_v27 = vadd.f32 %v781_v26, %v4327_v15 }
 0xe59   :  { %4119 = vtanh.f32 %v783_v27  ;;  %v3451_v4 = vmul.f32 -1.442695, %v783_v27 }
 0xe5b   :  { %4121 = vpow2.f32 %v3451_v4 }
 0xe66   :  { %v4120_v28 = vpop.eup %4119 }
 0xe67   :  { %798 = vrot.lane.b32.xlu0 %v4120_v28, %s4221_s9 }
 0xe68   :  { %v4122_v29 = vpop.eup %4121 }
 0xe69   :  { %v787_v30 = vadd.f32 1.0, %v4122_v29  ;;  %v1074_v29 = vld [vmem:[%s5059_s2 + $0x38] sm:$0xff] }
 0xe6b   :  { %4123 = vrcp.f32 %v787_v30  ;;  %v1073_v30 = vld [vmem:[%s5059_s2 + $0x30] sm:$0xff] }
 0xe78   :  { %v4124_v7 = vpop.eup %4123 }
 0xe79   :  { %v796_v33 = vmul.f32 %v4124_v7, %v794_v9  ;;  %v1070_v9 = vld [vmem:[%s5059_s2 + $0x18] sm:$0xff] }
 0xed9   :  { %v799_v31 = vpop.permute.xlu0 %798 }
 0xeda   :  { %v801_v32 = vmul.f32 %v4124_v7, %v799_v31  ;;  %v1071_v31 = vld [vmem:[%s5059_s2 + $0x20] sm:$0xff] }
 0xedc   :  { %803 = vrot.lane.b32.xlu0 %v801_v32, %s4222_s10  ;;  %v1053_v32 = vld [vmem:[%s5058_s0 + $0x2e] sm:$0x3] }
 0xedd   :  { %vm1054_vm9 = vcmp.gt.f32.partialorder %v1053_v32, 0.0  ;;  %v4629_v32 = vld [vmem:[%s5059_s2 + $0x98] sm:$0xff] }
 0xf4e   :  { %v804_v34 = vpop.permute.xlu0 %803 }
 0xf4f   :  { %v806_v35 = vadd.f32 %v804_v34, %v796_v33  ;;  %v1069_v33 = vld [vmem:[%s5059_s2 + $0x10] sm:$0xff]  ;;  %v1068_v34 = vld [vmem:[%s5059_s2 + $0x8] sm:$0xff] }
 0xf51   :  { %4125 = vtanh.f32 %v806_v35  ;;  %v822_v37 = vrot.slane %v806_v35, 2 }
 0xf5e   :  { %v4126_v36 = vpop.eup %4125 }
 0xf5f   :  { %809 = vrot.lane.b32.xlu1 %v4126_v36, %s4221_s9 }
 0xf63   :  { %823 = vrot.lane.b32.xlu1 %v822_v37, %s4223_s11  ;;  %v1067_v37 = vld [vmem:[%s5059_s2] sm:$0xff] }
 0xfd1   :  { %v810_v39 = vpop.permute.xlu1 %809 }
 0xfd2   :  { %v812_v40 = vmul.f32 %v4124_v7, %v810_v39  ;;  %v1072_v7 = vld [vmem:[%s5059_s2 + $0x28] sm:$0xff] }
 0xfd4   :  { %v816_v41 = vrot.slane %v812_v40, 2 }
 0xfd5   :  { %v824_v42 = vpop.permute.xlu1 %823 }
 0xfd6   :  { %v826_v43 = vsel %vm814_vm7, %v824_v42, %v706_v21  ;;  %817 = vrot.lane.b32.xlu0 %v816_v41, %s4222_s10 }
 0xfd7   :  { %v912_v44 = vrot.slane %v826_v43, 4 }
 0xfd9   :  { %913 = vrot.lane.b32.xlu1 %v912_v44, %s4222_s10 }
0x1048   :  { %v818_v45 = vpop.permute.xlu0 %817 }
0x1049   :  { %v820_v46 = vsel %vm814_vm7, %v818_v45, %v701_v24  ;;  %v1176_v45 = vld [vmem:[%s5059_s2 + $0x78] sm:$0xff] }
0x104a   :  { %3766 = vmatmul.mubr.msk.f32.vlgmr.msra.gmra.mxu1 %vm37_vm1, %v820_v46 }
0x104b   :  { %3795 = vmatprep.mubr.msk.f32.mxu1 %vm4220_vm0, %v4219_v2  ;;  %v914_v57 = vpop.permute.xlu1 %913  ;;  %3780 = vmatpush3.msra.mxu1 %v1074_v29 }
0x104c   :  { %3781 = vmatprep.subr.mxu1 %v4219_v2 }
0x104d   :  { %3782 = vmatpush3.msra.mxu1 %v1073_v30 }
0x104e   :  { %3783 = vmatprep.subr.mxu1 %v4219_v2 }
0x104f   :  { %3784 = vmatpush3.msra.mxu1 %v1072_v7 }
0x1050   :  { %3785 = vmatprep.subr.mxu1 %v4219_v2 }
0x1051   :  { %3786 = vmatpush3.msra.mxu1 %v1071_v31 }
0x1052   :  { %3787 = vmatprep.subr.mxu1 %v4219_v2 }
0x1053   :  { %3788 = vmatpush3.msra.mxu1 %v1070_v9  ;;  %v4634_v9 = vld [vmem:[%s5059_s2 + $0x90] sm:$0xff] }
0x1054   :  { %3789 = vmatprep.subr.mxu1 %v4219_v2 }
0x1055   :  { %3790 = vmatpush3.msra.mxu1 %v1069_v33  ;;  %v4641_v33 = vld [vmem:[%s5059_s2 + $0x88] sm:$0xff] }
0x1056   :  { %3791 = vmatprep.subr.mxu1 %v4219_v2 }
0x1057   :  { %3792 = vmatpush3.msra.mxu1 %v1068_v34  ;;  %v4648_v34 = vld [vmem:[%s5059_s2 + $0x80] sm:$0xff] }
0x1058   :  { %3793 = vmatprep.subr.mxu1 %v4219_v2 }
0x1059   :  { %3794 = vmatpush3.msra.mxu1 %v1067_v37 }
0x105a   :  { %3820 = vmatprep.subr.mxu1 %v4219_v2 }
0x110a   :  { %v896_v47 = vpop.f32.mrf.mxu1 }
0x110b   :  { %v901_v48 = vrot.slane %v896_v47, 4  ;;  %v1174_v47 = vld [vmem:[%s5059_s2 + $0x68] sm:$0xff] }
0x110c   :  { %v3767_v49 = vpop.f32.mrf.mxu1 }
0x110d   :  { %v903_v18 = vadd.f32 %v901_v48, %v4327_v15  ;;  %v1173_v48 = vld [vmem:[%s5059_s2 + $0x60] sm:$0xff]  ;;  %v1178_v49 = vld [vmem:[%s5058_s0 + $0x34] sm:$0x3] }
0x110f   :  { %4127 = vtanh.f32 %v903_v18  ;;  %v3453_v51 = vmul.f32 -1.442695, %v903_v18  ;;  %v1172_v18 = vld [vmem:[%s5059_s2 + $0x58] sm:$0xff] }
0x1111   :  { %4129 = vpow2.f32 %v3453_v51  ;;  %v3456_v51 = vld [vmem:[%s5059_s2 + $0xa0] ss:$0 sm:$0xff] }
0x111c   :  { %v4128_v50 = vpop.eup %4127 }
0x111d   :  { %918 = vrot.lane.b32.xlu0 %v4128_v50, %s4221_s9  ;;  %v1171_v50 = vld [vmem:[%s5059_s2 + $0x50] sm:$0xff] }
0x111e   :  { %v4130_v52 = vpop.eup %4129 }
0x111f   :  { %v907_v53 = vadd.f32 1.0, %v4130_v52 }
0x1121   :  { %4131 = vrcp.f32 %v907_v53 }
0x112e   :  { %v4132_v54 = vpop.eup %4131 }
0x112f   :  { %v916_v58 = vmul.f32 %v4132_v54, %v914_v57  ;;  %v1170_v57 = vld [vmem:[%s5059_s2 + $0x48] sm:$0xff] }
0x118f   :  { %v919_v55 = vpop.permute.xlu0 %918 }
0x1190   :  { %v921_v56 = vmul.f32 %v4132_v54, %v919_v55 }
0x1192   :  { %923 = vrot.lane.b32.xlu0 %v921_v56, %s4222_s10 }
0x1204   :  { %v924_v59 = vpop.permute.xlu0 %923 }
0x1205   :  { %v926_v60 = vadd.f32 %v924_v59, %v916_v58  ;;  %v1169_v58 = vld [vmem:[%s5059_s2 + $0x40] sm:$0xff]  ;;  %v4564_v59 = vld [vmem:[%s5057_s1 + $0x58] sm:$0xff] }
0x1207   :  { %4133 = vtanh.f32 %v926_v60  ;;  %v942_v62 = vrot.slane %v926_v60, 4  ;;  %v4569_v60 = vld [vmem:[%s5057_s1 + $0x50] sm:$0xff] }
0x1214   :  { %v4134_v61 = vpop.eup %4133 }
0x1215   :  { %929 = vrot.lane.b32.xlu1 %v4134_v61, %s4221_s9 }
0x1219   :  { %943 = vrot.lane.b32.xlu1 %v942_v62, %s4223_s11 }
0x1287   :  { %v930_v0 = vpop.permute.xlu1 %929 }
0x1288   :  { %v932_v1 = vmul.f32 %v4132_v54, %v930_v0  ;;  %v1159_v0 = vld [vmem:[%s5058_s0 + $0x32] sm:$0x3] }
0x128a   :  { %v936_v5 = vrot.slane %v932_v1, 4 }
0x128b   :  { %v944_v6 = vpop.permute.xlu1 %943 }
0x128c   :  { %v946_v8 = vsel %vm934_vm8, %v944_v6, %v826_v43  ;;  %937 = vrot.lane.b32.xlu0 %v936_v5, %s4222_s10 }
0x128d   :  { %v1032_v10 = vrot.slane %v946_v8, 2 }
0x128f   :  { %1033 = vrot.lane.b32.xlu1 %v1032_v10, %s4222_s10  ;;  %v4594_v10 = vld [vmem:[%s5057_s1 + $0x40] sm:$0xff] }
0x12fe   :  { %v938_v11 = vpop.permute.xlu0 %937 }
0x12ff   :  { %v4463_v12 = vsel %vm934_vm8, %v938_v11, %v820_v46  ;;  %v1175_v46 = vld [vmem:[%s5059_s2 + $0x70] sm:$0xff]  ;;  %v3458_v11 = vld [vmem:[%s5059_s2 + $0xa1] ss:$0 sm:$0xff] }
0x1300   :  { %3777 = vmatmul.mubr.msk.f32.vlgmr.msra.gmra.mxu0 %vm37_vm1, %v4463_v12 }
0x1301   :  { %3806 = vmatprep.mubr.msk.f32.mxu0 %vm4220_vm0, %v4219_v2  ;;  %v1034_v26 = vpop.permute.xlu1 %1033  ;;  %3799 = vmatpush3.msra.mxu0 %v1176_v45 }
0x1302   :  { %3800 = vmatprep.subr.mxu0 %v4219_v2 }
0x1303   :  { %3801 = vmatpush3.msra.mxu0 %v1175_v46 }
0x1304   :  { %3802 = vmatprep.subr.mxu0 %v4219_v2 }
0x1305   :  { %3803 = vmatpush3.msra.mxu0 %v1174_v47 }
0x1306   :  { %3804 = vmatprep.subr.mxu0 %v4219_v2 }
0x1307   :  { %3805 = vmatpush3.msra.mxu0 %v1173_v48 }
0x1308   :  { %3807 = vmatmul.mubr.msk.f32.vlgmr.msra.gmra.mxu0 %vm37_vm1, %v1178_v49  ;;  %3809 = vmatprep.subr.mxu0 %v4219_v2 }
0x1309   :  { %3810 = vmatpush3.msra.mxu0 %v1172_v18  ;;  %3817 = vmatprep.mubr.msk.f32.mxu0 %vm4220_vm0, %v4219_v2 }
0x130a   :  { %3811 = vmatprep.subr.mxu0 %v4219_v2 }
0x130b   :  { %3812 = vmatpush3.msra.mxu0 %v1171_v50 }
0x130c   :  { %3813 = vmatprep.subr.mxu0 %v4219_v2 }
0x130d   :  { %3814 = vmatpush3.msra.mxu0 %v1170_v57 }
0x130e   :  { %3815 = vmatprep.subr.mxu0 %v4219_v2 }
0x130f   :  { %3816 = vmatpush3.msra.mxu0 %v1169_v58 }
0x1310   :  { %3831 = vmatprep.subr.mxu0 %v4219_v2 }
0x13c0   :  { %v1016_v13 = vpop.f32.mrf.mxu0 }
0x13c1   :  { %v1021_v14 = vrot.slane %v1016_v13, 2 }
0x13c2   :  { %v3778_v16 = vpop.f32.mrf.mxu0 }
0x13c3   :  { %v1023_v17 = vadd.f32 %v1021_v14, %v4327_v15 }
0x13c5   :  { %4135 = vtanh.f32 %v1023_v17  ;;  %v3455_v20 = vmul.f32 -1.442695, %v1023_v17  ;;  %v1338_v17 = vlaneseq }
0x13c7   :  { %4137 = vpow2.f32 %v3455_v20 }
0x13c8   :  { %v1252_v62 = vpop.f32.mrf.mxu0 }
0x13ca   :  { %v3808_v63 = vpop.f32.mrf.mxu0 }
0x13d2   :  { %v4136_v19 = vpop.eup %4135 }
0x13d3   :  { %1038 = vrot.lane.b32.xlu0 %v4136_v19, %s4221_s9  ;;  %v4612_v19 = vshrl.u32 %v1338_v17, 7 }
0x13d4   :  { %v4138_v21 = vpop.eup %4137 }
0x13d5   :  { %v1027_v22 = vadd.f32 1.0, %v4138_v21  ;;  %v1342_v20 = vsub.s32 1, %v4612_v19  ;;  %v4618_v21 = vld [vmem:[%s5057_s1 + $0x60] sm:$0xff] }
0x13d7   :  { %4139 = vrcp.f32 %v1027_v22  ;;  %v1343_v22 = vrot.slane %v4618_v21, %v1342_v20 }
0x13e4   :  { %v4140_v23 = vpop.eup %4139 }
0x13e5   :  { %v1036_v3 = vmul.f32 %v4140_v23, %v1034_v26 }
0x1445   :  { %v1039_v24 = vpop.permute.xlu0 %1038 }
0x1446   :  { %v1041_v25 = vmul.f32 %v4140_v23, %v1039_v24 }
0x1448   :  { %1043 = vrot.lane.b32.xlu0 %v1041_v25, %s4222_s10 }
0x14ba   :  { %v1044_v27 = vpop.permute.xlu0 %1043 }
0x14bb   :  { %v1046_v28 = vadd.f32 %v1044_v27, %v1036_v3 }
0x14bd   :  { %4141 = vtanh.f32 %v1046_v28  ;;  %v1062_v15 = vrot.slane %v1046_v28, 6 }
0x14bf   :  { %1063 = vrot.lane.b32.xlu0 %v1062_v15, %s4223_s11 }
0x14ca   :  { %v4142_v4 = vpop.eup %4141 }
0x14cb   :  { %1049 = vrot.lane.b32.xlu1 %v4142_v4, %s4221_s9 }
0x1531   :  { %v1064_v35 = vpop.permute.xlu0 %1063 }
0x1532   :  { %v1066_v36 = vsel %vm1054_vm9, %v1064_v35, %v946_v8  ;;  %v4587_v8 = vld [vmem:[%s5057_s1 + $0x48] sm:$0xff] }
0x1533   :  { %1077 = vrot.lane.b32.xlu0 %v1066_v36, %s4222_s10 }
0x153d   :  { %v1050_v38 = vpop.permute.xlu1 %1049 }
0x153e   :  { %v1052_v39 = vmul.f32 %v4140_v23, %v1050_v38 }
0x1540   :  { %v1056_v40 = vrot.slane %v1052_v39, 6  ;;  %v4673_v39 = vld [vmem:[%s5059_s2 + $0xa2] ss:$0 sm:$0xff] }
0x1542   :  { %1057 = vrot.lane.b32.xlu1 %v1056_v40, %s4222_s10  ;;  %v1339_v40 = vand.u32 127, %v1338_v17 }
0x1544   :  { %v4680_v47 = vsub.s32 31, %v1339_v40 }
0x15a5   :  { %v1078_v42 = vpop.permute.xlu0 %1077 }
0x15b4   :  { %v1058_v41 = vpop.permute.xlu1 %1057 }
0x15b5   :  { %v1060_v43 = vsel %vm1054_vm9, %v1058_v41, %v4463_v12  ;;  %v1253_v12 = vadd.f32 %v3458_v11, %v1252_v62  ;;  %v4702_v62 = vld [vmem:[%s5057_s1 + $0x68] sm:$0xff] }
0x15b6   :  { %v1080_v44 = vsel %vm37_vm1, %v1060_v43, %v1078_v42 }
0x15b7   :  { %3796 = vmatmul.mubr.msk.f32.vlgmr.msra.gmra.mxu1 %vm1085_vm10, %v1080_v44 }
0x15b8   :  { %3828 = vmatprep.mubr.msk.f32.mxu1 %vm4220_vm0, %v4219_v2  ;;  %3821 = vmatpush3.msra.mxu1 %v4564_v59 }
0x15b9   :  { %3822 = vmatprep.subr.mxu1 %v4219_v2 }
0x15ba   :  { %3823 = vmatpush3.msra.mxu1 %v4569_v60 }
0x15bb   :  { %3824 = vmatprep.subr.mxu1 %v4219_v2 }
0x15bc   :  { %3825 = vmatpush3.msra.mxu1 %v4587_v8 }
0x15bd   :  { %3826 = vmatprep.subr.mxu1 %v4219_v2 }
0x15be   :  { %3827 = vmatpush3.msra.mxu1 %v4594_v10 }
0x15bf   :  { %3842 = vmatprep.subr.mxu1 %v4219_v2 }
0x1677   :  { %v1155_v52 = vpop.f32.mrf.mxu1 }
0x1678   :  { %v4551_v53 = vadd.f32 %v3456_v51, %v1155_v52 }
0x1679   :  { %v3797_v54 = vpop.f32.mrf.mxu1 }
0x167a   :  { %v1160_v55 = vmul.f32 0.5, %v4551_v53  ;;  %v4688_v54 = vld [vmem:[%s5057_s1 + $0x78] sm:$0xff] }
0x167c   :  { %v1161_v56 = vmul.f32 1.442695, %v1160_v55 }
0x167e   :  { %4143 = vpow2.f32 %v1161_v56 }
0x168b   :  { %v4144_v61 = vpop.eup %4143 }
0x168c   :  { %1164 = vrot.lane.b32.xlu1 %v4144_v61, %s4223_s11  ;;  %v4695_v61 = vld [vmem:[%s5057_s1 + $0x70] sm:$0xff] }
0x16fe   :  { %v1165_v1 = vpop.permute.xlu1 %1164 }
0x16ff   :  { %v1167_v5 = vmul.f32 %v1165_v1, %v1159_v0 }
0x1701   :  { %v1168_v6 = vadd.f32 %v1167_v5, %v4551_v53 }
0x1703   :  { %3818 = vmatmul.mubr.msk.f32.vlgmr.msra.gmra.mxu0 %vm37_vm1, %v1168_v6 }
0x1704   :  { %3839 = vmatprep.mubr.msk.f32.mxu0 %vm4220_vm0, %v4219_v2  ;;  %3832 = vmatpush3.msra.mxu0 %v4629_v32 }
0x1705   :  { %3833 = vmatprep.subr.mxu0 %v4219_v2 }
0x1706   :  { %3834 = vmatpush3.msra.mxu0 %v4634_v9 }
0x1707   :  { %3835 = vmatprep.subr.mxu0 %v4219_v2 }
0x1708   :  { %3836 = vmatpush3.msra.mxu0 %v4641_v33 }
0x1709   :  { %3837 = vmatprep.subr.mxu0 %v4219_v2 }
0x170a   :  { %3838 = vmatpush3.msra.mxu0 %v4648_v34 }
0x170b   :  { %3853 = vmatprep.subr.mxu0 %v4219_v2 }
0x17c3   :  { %v1325_v13 = vpop.f32.mrf.mxu0 }
0x17c4   :  { %v1326_v14 = vadd.f32 %v1325_v13, %v1253_v12 }
0x17c5   :  { %v3819_v16 = vpop.f32.mrf.mxu0 }
0x17c6   :  { %3829 = vmatmul.mubr.msk.f32.vlgmr.msra.gmra.mxu1 %vm37_vm1, %v1326_v14 }
0x17c7   :  { %3843 = vmatpush3.msra.mxu1 %v4564_v59  ;;  %3850 = vmatprep.mubr.msk.f32.mxu1 %vm4220_vm0, %v4219_v2 }
0x17c8   :  { %3844 = vmatprep.subr.mxu1 %v4219_v2 }
0x17c9   :  { %3845 = vmatpush3.msra.mxu1 %v4569_v60 }
0x17ca   :  { %3846 = vmatprep.subr.mxu1 %v4219_v2 }
0x17cb   :  { %3847 = vmatpush3.msra.mxu1 %v4587_v8 }
0x17cc   :  { %3848 = vmatprep.subr.mxu1 %v4219_v2 }
0x17cd   :  { %3849 = vmatpush3.msra.mxu1 %v4594_v10 }
0x17ce   :  { %3864 = vmatprep.subr.mxu1 %v4219_v2 }
0x1886   :  { %v1413_v23 = vpop.f32.mrf.mxu1 }
0x1887   :  { %v1417_v24 = vadd.f32 %v1413_v23, %v1343_v22 }
0x1888   :  { %v3830_v25 = vpop.f32.mrf.mxu1 }
0x1889   :  { %4145 = vtanh.f32 %v1417_v24  ;;  %v3463_v3 = vmul.f32 -1.442695, %v1417_v24 }
0x188b   :  { %4147 = vpow2.f32 %v3463_v3 }
0x1896   :  { %v4146_v26 = vpop.eup %4145 }
0x1897   :  { %1427 = vrot.lane.b32.xlu0 %v4146_v26, %s4221_s9 }
0x1898   :  { %v4148_v27 = vpop.eup %4147 }
0x1899   :  { %v1421_v28 = vadd.f32 1.0, %v4148_v27 }
0x189b   :  { %4149 = vrcp.f32 %v1421_v28 }
0x18a8   :  { %v4150_v15 = vpop.eup %4149 }
0x18a9   :  { %v1425_v30 = vmul.f32 %v4150_v15, %v1326_v14 }
0x1909   :  { %v1428_v4 = vpop.permute.xlu0 %1427 }
0x190a   :  { %v1430_v29 = vmul.f32 %v4150_v15, %v1428_v4 }
0x190c   :  { %1432 = vrot.lane.b32.xlu1 %v1430_v29, %s4222_s10 }
0x197e   :  { %v1433_v7 = vpop.permute.xlu1 %1432 }
0x197f   :  { %v4623_v31 = vadd.f32 %v1433_v7, %v1425_v30 }
0x1981   :  { %4151 = vtanh.f32 %v4623_v31 }
0x198e   :  { %v4152_v35 = vpop.eup %4151 }
0x198f   :  { %1438 = vrot.lane.b32.xlu0 %v4152_v35, %s4221_s9 }
0x1a01   :  { %v1439_v36 = vpop.permute.xlu0 %1438 }
0x1a02   :  { %v1441_v37 = vmul.f32 %v4150_v15, %v1439_v36 }
0x1a04   :  { %1443 = vrot.lane.b32.xlu1 %v1441_v37, %s4222_s10 }
0x1a76   :  { %v1444_v38 = vpop.permute.xlu1 %1443 }
0x1a77   :  { %3840 = vmatmul.mubr.msk.f32.vlgmr.msra.gmra.mxu0 %vm37_vm1, %v1444_v38  ;;  %3851 = vmatmul.mubr.msk.f32.vlgmr.msra.gmra.mxu1 %vm37_vm1, %v1444_v38 }
0x1a78   :  { %3861 = vmatprep.mubr.msk.f32.mxu0 %vm4220_vm0, %v4219_v2  ;;  %3865 = vmatpush3.msra.mxu1 %v4629_v32 }
0x1a79   :  { %3866 = vmatprep.subr.mxu1 %v4219_v2  ;;  %3872 = vmatprep.mubr.msk.f32.mxu1 %vm4220_vm0, %v4219_v2 }
0x1a7a   :  { %3867 = vmatpush3.msra.mxu1 %v4634_v9  ;;  %3854 = vmatpush3.msra.mxu0 %v4688_v54 }
0x1a7b   :  { %3868 = vmatprep.subr.mxu1 %v4219_v2  ;;  %3855 = vmatprep.subr.mxu0 %v4219_v2 }
0x1a7c   :  { %3869 = vmatpush3.msra.mxu1 %v4641_v33  ;;  %3856 = vmatpush3.msra.mxu0 %v4695_v61 }
0x1a7d   :  { %3870 = vmatprep.subr.mxu1 %v4219_v2  ;;  %3857 = vmatprep.subr.mxu0 %v4219_v2 }
0x1a7e   :  { %3871 = vmatpush3.msra.mxu1 %v4648_v34  ;;  %3858 = vmatpush3.msra.mxu0 %v4702_v62 }
0x1a7f   :  { %3886 = vmatprep.subr.mxu1 %v4219_v2  ;;  %3859 = vmatprep.subr.mxu0 %v4219_v2 }
0x1a80   :  { %3860 = vmatpush3.msra.mxu0 %v4618_v21 }
0x1a81   :  { %3875 = vmatprep.subr.mxu0 %v4219_v2 }
0x1b37   :  { %v1513_v41 = vpop.f32.mrf.mxu0  ;;  %v1609_v42 = vpop.f32.mrf.mxu1 }
0x1b38   :  { %v4676_v43 = vadd.f32 %v4673_v39, %v1513_v41 }
0x1b39   :  { %v3841_v44 = vpop.f32.mrf.mxu0  ;;  %v3852_v45 = vpop.f32.mrf.mxu1 }
0x1b3a   :  { %vm1518_vm11 = vcmp.lt.s32.totalorder %v4676_v43, 0  ;;  %v1519_v46 = vxor.u32 2147483647, %v4676_v43 }
0x1b3c   :  { %v1520_v48 = vsel %vm1518_vm11, %v1519_v46, %v4676_v43 }
0x1b3d   :  { %v1521_v49 = vand.u32 4294967264, %v1520_v48 }
0x1b3f   :  { %v1523_v18 = vor.u32 %v4680_v47, %v1521_v49 }
0x1b41   :  { %v1525_v50 = vsel %vm1524_vm12, %v1523_v18, 2147483648 }
0x1b42   :  { %v1527_v51 = vshra.s32 %v1525_v50, 16  ;;  %v1526_v55 = vand.u32 65535, %v1525_v50 }
0x1b44   :  { %v1529_v52 = vcvt.s32.f32 %v1527_v51  ;;  %v1528_v57 = vcvt.s32.f32 %v1526_v55 }
0x1b46   :  { %1530 = vmax.xlane.f32.xlu0 %v1529_v52 }
0x1bcf   :  { %v1531_v56 = vpop.xlane.xlu0 %1530 }
0x1bd0   :  { %vm1532_vm13 = vcmp.eq.f32.partialorder %v1529_v52, %v1531_v56  ;;  %v1537_v63 = vcvt.f32.s32 %v1531_v56 }
0x1bd1   :  { %v1533_v58 = vsel %vm1532_vm13, %v1528_v57, -inf }
0x1bd2   :  { %1534 = vmax.xlane.f32.xlu1 %v1533_v58  ;;  %v1538_v1 = vshll.u32 %v1537_v63, 16 }
0x1c5b   :  { %v1535_v0 = vpop.xlane.xlu1 %1534 }
0x1c5c   :  { %v1536_v5 = vcvt.f32.s32 %v1535_v0 }
0x1c5e   :  { %v1539_v6 = vadd.s32 %v1538_v1, %v1536_v5 }
0x1c60   :  { %vm1540_vm14 = vcmp.eq.s32.totalorder %v1523_v18, %v1539_v6 }
0x1c61   :  { %v3465_v11 = vsel %vm1540_vm14, 1.0, %v4219_v2 }
0x1c62   :  { %3862 = vmatmul.mubr.msk.f32.vlgmr.msra.gmra.mxu0 %vm37_vm1, %v3465_v11 }
0x1c63   :  { %3876 = vmatpush3.msra.mxu0 %v4564_v59  ;;  %3883 = vmatprep.mubr.msk.f32.mxu0 %vm4220_vm0, %v4219_v2 }
0x1c64   :  { %3877 = vmatprep.subr.mxu0 %v4219_v2 }
0x1c65   :  { %3878 = vmatpush3.msra.mxu0 %v4569_v60 }
0x1c66   :  { %3879 = vmatprep.subr.mxu0 %v4219_v2 }
0x1c67   :  { %3880 = vmatpush3.msra.mxu0 %v4587_v8 }
0x1c68   :  { %3881 = vmatprep.subr.mxu0 %v4219_v2 }
0x1c69   :  { %3882 = vmatpush3.msra.mxu0 %v4594_v10 }
0x1c6a   :  { %3897 = vmatprep.subr.mxu0 %v4219_v2 }
0x1d22   :  { %v1682_v12 = vpop.f32.mrf.mxu0 }
0x1d23   :  { %v1683_v13 = vadd.f32 %v1682_v12, %v1609_v42 }
0x1d24   :  { %v3863_v14 = vpop.f32.mrf.mxu0 }
0x1d25   :  { %4153 = vtanh.f32 %v1683_v13  ;;  %v3468_v17 = vmul.f32 -1.442695, %v1683_v13 }
0x1d27   :  { %4155 = vpow2.f32 %v3468_v17 }
0x1d32   :  { %v4154_v16 = vpop.eup %4153 }
0x1d33   :  { %1695 = vrot.lane.b32.xlu0 %v4154_v16, %s4221_s9 }
0x1d34   :  { %v4156_v20 = vpop.eup %4155 }
0x1d35   :  { %v1689_v22 = vadd.f32 1.0, %v4156_v20 }
0x1d37   :  { %4157 = vrcp.f32 %v1689_v22 }
0x1d44   :  { %v4158_v23 = vpop.eup %4157 }
0x1d45   :  { %v1693_v26 = vmul.f32 %v4158_v23, %v4623_v31 }
0x1da5   :  { %v1696_v24 = vpop.permute.xlu0 %1695 }
0x1da6   :  { %v1698_v25 = vmul.f32 %v4158_v23, %v1696_v24 }
0x1da8   :  { %1700 = vrot.lane.b32.xlu1 %v1698_v25, %s4222_s10 }
0x1e1a   :  { %v1701_v3 = vpop.permute.xlu1 %1700 }
0x1e1b   :  { %v4723_v27 = vadd.f32 %v1701_v3, %v1693_v26 }
0x1e1d   :  { %4159 = vtanh.f32 %v4723_v27 }
0x1e2a   :  { %v4160_v28 = vpop.eup %4159 }
0x1e2b   :  { %1706 = vrot.lane.b32.xlu0 %v4160_v28, %s4221_s9 }
0x1e9d   :  { %v1707_v15 = vpop.permute.xlu0 %1706 }
0x1e9e   :  { %v1709_v4 = vmul.f32 %v4158_v23, %v1707_v15 }
0x1ea0   :  { %1711 = vrot.lane.b32.xlu1 %v1709_v4, %s4222_s10 }
0x1f12   :  { %v1712_v29 = vpop.permute.xlu1 %1711 }
0x1f13   :  { %3873 = vmatmul.mubr.msk.f32.vlgmr.msra.gmra.mxu1 %vm37_vm1, %v1712_v29  ;;  %3884 = vmatmul.mubr.msk.f32.vlgmr.msra.gmra.mxu0 %vm37_vm1, %v1712_v29 }
0x1f14   :  { %3887 = vmatpush3.msra.mxu1 %v4688_v54  ;;  %3894 = vmatprep.mubr.msk.f32.mxu1 %vm4220_vm0, %v4219_v2 }
0x1f15   :  { %3888 = vmatprep.subr.mxu1 %v4219_v2  ;;  %3898 = vmatpush3.msra.mxu0 %v4629_v32 }
0x1f16   :  { %3889 = vmatpush3.msra.mxu1 %v4695_v61  ;;  %3899 = vmatprep.subr.mxu0 %v4219_v2 }
0x1f17   :  { %3890 = vmatprep.subr.mxu1 %v4219_v2  ;;  %3900 = vmatpush3.msra.mxu0 %v4634_v9 }
0x1f18   :  { %3891 = vmatpush3.msra.mxu1 %v4702_v62  ;;  %3901 = vmatprep.subr.mxu0 %v4219_v2 }
0x1f19   :  { %3892 = vmatprep.subr.mxu1 %v4219_v2  ;;  %3902 = vmatpush3.msra.mxu0 %v4641_v33 }
0x1f1a   :  { %3893 = vmatpush3.msra.mxu1 %v4618_v21  ;;  %3903 = vmatprep.subr.mxu0 %v4219_v2 }
0x1f1b   :  { %3908 = vmatprep.subr.mxu1 %v4219_v2  ;;  %3904 = vmatpush3.msra.mxu0 %v4648_v34 }
0x1f1c   :  { %3905 = vmatprep.mubr.msk.f32.mxu0 %vm4220_vm0, %v4219_v2  ;;  %3919 = vmatprep.subr.mxu0 %v4219_v2 }
0x1fd3   :  { %v1781_v30 = vpop.f32.mrf.mxu1  ;;  %v1875_v7 = vpop.f32.mrf.mxu0 }
0x1fd4   :  { %v4751_v31 = vadd.f32 %v4673_v39, %v1781_v30 }
0x1fd5   :  { %v3874_v35 = vpop.f32.mrf.mxu1  ;;  %v3885_v36 = vpop.f32.mrf.mxu0 }
0x1fd6   :  { %vm1786_vm15 = vcmp.lt.s32.totalorder %v4751_v31, 0  ;;  %v1787_v37 = vxor.u32 2147483647, %v4751_v31 }
0x1fd8   :  { %v1788_v38 = vsel %vm1786_vm15, %v1787_v37, %v4751_v31 }
0x1fd9   :  { %v1789_v40 = vand.u32 4294967264, %v1788_v38 }
0x1fdb   :  { %v1790_v41 = vor.u32 %v1789_v40, %v4680_v47 }
0x1fdd   :  { %v1791_v42 = vsel %vm1524_vm12, %v1790_v41, 2147483648 }
0x1fde   :  { %v1793_v44 = vshra.s32 %v1791_v42, 16  ;;  %v1792_v46 = vand.u32 65535, %v1791_v42 }
0x1fe0   :  { %v1795_v45 = vcvt.s32.f32 %v1793_v44  ;;  %v1794_v49 = vcvt.s32.f32 %v1792_v46 }
0x1fe2   :  { %1796 = vmax.xlane.f32.xlu0 %v1795_v45 }
0x206b   :  { %v1797_v48 = vpop.xlane.xlu0 %1796 }
0x206c   :  { %vm1798_vm2 = vcmp.eq.f32.partialorder %v1795_v45, %v1797_v48  ;;  %v1803_v50 = vcvt.f32.s32 %v1797_v48 }
0x206d   :  { %v1799_v18 = vsel %vm1798_vm2, %v1794_v49, -inf }
0x206e   :  { %1800 = vmax.xlane.f32.xlu1 %v1799_v18  ;;  %v1804_v52 = vshll.u32 %v1803_v50, 16 }
0x20f7   :  { %v1801_v51 = vpop.xlane.xlu1 %1800 }
0x20f8   :  { %v1802_v55 = vcvt.f32.s32 %v1801_v51 }
0x20fa   :  { %v1805_v56 = vadd.s32 %v1804_v52, %v1802_v55 }
0x20fc   :  { %vm1806_vm3 = vcmp.eq.s32.totalorder %v1790_v41, %v1805_v56 }
0x20fd   :  { %v3470_v57 = vsel %vm1806_vm3, 1.0, %v4219_v2 }
0x20fe   :  { %3895 = vmatmul.mubr.msk.f32.vlgmr.msra.gmra.mxu1 %vm37_vm1, %v3470_v57 }
0x20ff   :  { %3909 = vmatpush3.msra.mxu1 %v4564_v59  ;;  %3916 = vmatprep.mubr.msk.f32.mxu1 %vm4220_vm0, %v4219_v2 }
0x2100   :  { %3910 = vmatprep.subr.mxu1 %v4219_v2 }
0x2101   :  { %3911 = vmatpush3.msra.mxu1 %v4569_v60 }
0x2102   :  { %3912 = vmatprep.subr.mxu1 %v4219_v2 }
0x2103   :  { %3913 = vmatpush3.msra.mxu1 %v4587_v8 }
0x2104   :  { %3914 = vmatprep.subr.mxu1 %v4219_v2 }
0x2105   :  { %3915 = vmatpush3.msra.mxu1 %v4594_v10 }
0x2106   :  { %3930 = vmatprep.subr.mxu1 %v4219_v2 }
0x21be   :  { %v1948_v58 = vpop.f32.mrf.mxu1 }
0x21bf   :  { %v1949_v63 = vadd.f32 %v1948_v58, %v1875_v7 }
0x21c0   :  { %v3896_v0 = vpop.f32.mrf.mxu1 }
0x21c1   :  { %4161 = vtanh.f32 %v1949_v63  ;;  %v3473_v5 = vmul.f32 -1.442695, %v1949_v63 }
0x21c3   :  { %4163 = vpow2.f32 %v3473_v5 }
0x21ce   :  { %v4162_v1 = vpop.eup %4161 }
0x21cf   :  { %1961 = vrot.lane.b32.xlu0 %v4162_v1, %s4221_s9 }
0x21d0   :  { %v4164_v6 = vpop.eup %4163 }
0x21d1   :  { %v1955_v11 = vadd.f32 1.0, %v4164_v6 }
0x21d3   :  { %4165 = vrcp.f32 %v1955_v11 }
0x21e0   :  { %v4166_v12 = vpop.eup %4165 }
0x21e1   :  { %v1959_v16 = vmul.f32 %v4166_v12, %v4723_v27 }
0x2241   :  { %v1962_v13 = vpop.permute.xlu0 %1961 }
0x2242   :  { %v1964_v14 = vmul.f32 %v4166_v12, %v1962_v13 }
0x2244   :  { %1966 = vrot.lane.b32.xlu1 %v1964_v14, %s4222_s10 }
0x22b6   :  { %v1967_v17 = vpop.permute.xlu1 %1966 }
0x22b7   :  { %v4773_v20 = vadd.f32 %v1967_v17, %v1959_v16 }
0x22b9   :  { %4167 = vtanh.f32 %v4773_v20 }
0x22c6   :  { %v4168_v22 = vpop.eup %4167 }
0x22c7   :  { %1972 = vrot.lane.b32.xlu0 %v4168_v22, %s4221_s9 }
0x2339   :  { %v1973_v23 = vpop.permute.xlu0 %1972 }
0x233a   :  { %v1975_v24 = vmul.f32 %v4166_v12, %v1973_v23 }
0x233c   :  { %1977 = vrot.lane.b32.xlu1 %v1975_v24, %s4222_s10 }
0x23ae   :  { %v1978_v25 = vpop.permute.xlu1 %1977 }
0x23af   :  { %3906 = vmatmul.mubr.msk.f32.vlgmr.msra.gmra.mxu0 %vm37_vm1, %v1978_v25  ;;  %3917 = vmatmul.mubr.msk.f32.vlgmr.msra.gmra.mxu1 %vm37_vm1, %v1978_v25 }
0x23b0   :  { %3920 = vmatpush3.msra.mxu0 %v4688_v54  ;;  %3927 = vmatprep.mubr.msk.f32.mxu0 %vm4220_vm0, %v4219_v2 }
0x23b1   :  { %3921 = vmatprep.subr.mxu0 %v4219_v2  ;;  %3931 = vmatpush3.msra.mxu1 %v4629_v32 }
0x23b2   :  { %3922 = vmatpush3.msra.mxu0 %v4695_v61  ;;  %3932 = vmatprep.subr.mxu1 %v4219_v2 }
0x23b3   :  { %3923 = vmatprep.subr.mxu0 %v4219_v2  ;;  %3933 = vmatpush3.msra.mxu1 %v4634_v9 }
0x23b4   :  { %3924 = vmatpush3.msra.mxu0 %v4702_v62  ;;  %3934 = vmatprep.subr.mxu1 %v4219_v2 }
0x23b5   :  { %3925 = vmatprep.subr.mxu0 %v4219_v2  ;;  %3935 = vmatpush3.msra.mxu1 %v4641_v33 }
0x23b6   :  { %3926 = vmatpush3.msra.mxu0 %v4618_v21  ;;  %3936 = vmatprep.subr.mxu1 %v4219_v2 }
0x23b7   :  { %3941 = vmatprep.subr.mxu0 %v4219_v2  ;;  %3937 = vmatpush3.msra.mxu1 %v4648_v34 }
0x23b8   :  { %3938 = vmatprep.mubr.msk.f32.mxu1 %vm4220_vm0, %v4219_v2  ;;  %3952 = vmatprep.subr.mxu1 %v4219_v2 }
0x246f   :  { %v2047_v26 = vpop.f32.mrf.mxu0  ;;  %v2141_v3 = vpop.f32.mrf.mxu1 }
0x2470   :  { %v4801_v27 = vadd.f32 %v4673_v39, %v2047_v26 }
0x2471   :  { %v3907_v28 = vpop.f32.mrf.mxu0  ;;  %v3918_v15 = vpop.f32.mrf.mxu1 }
0x2472   :  { %vm2052_vm4 = vcmp.lt.s32.totalorder %v4801_v27, 0  ;;  %v2053_v4 = vxor.u32 2147483647, %v4801_v27 }
0x2474   :  { %v2054_v29 = vsel %vm2052_vm4, %v2053_v4, %v4801_v27 }
0x2475   :  { %v2055_v30 = vand.u32 4294967264, %v2054_v29 }
0x2477   :  { %v2056_v7 = vor.u32 %v2055_v30, %v4680_v47 }
0x2479   :  { %v2057_v35 = vsel %vm1524_vm12, %v2056_v7, 2147483648 }
0x247a   :  { %v2059_v36 = vshra.s32 %v2057_v35, 16  ;;  %v2058_v38 = vand.u32 65535, %v2057_v35 }
0x247c   :  { %v2061_v37 = vcvt.s32.f32 %v2059_v36  ;;  %v2060_v41 = vcvt.s32.f32 %v2058_v38 }
0x247e   :  { %2062 = vmax.xlane.f32.xlu0 %v2061_v37 }
0x2507   :  { %v2063_v40 = vpop.xlane.xlu0 %2062 }
0x2508   :  { %vm2064_vm5 = vcmp.eq.f32.partialorder %v2061_v37, %v2063_v40  ;;  %v2069_v44 = vcvt.f32.s32 %v2063_v40 }
0x2509   :  { %v2065_v42 = vsel %vm2064_vm5, %v2060_v41, -inf }
0x250a   :  { %2066 = vmax.xlane.f32.xlu1 %v2065_v42  ;;  %v2070_v46 = vshll.u32 %v2069_v44, 16 }
0x2593   :  { %v2067_v45 = vpop.xlane.xlu1 %2066 }
0x2594   :  { %v2068_v48 = vcvt.f32.s32 %v2067_v45 }
0x2596   :  { %v2071_v49 = vadd.s32 %v2070_v46, %v2068_v48 }
0x2598   :  { %vm2072_vm6 = vcmp.eq.s32.totalorder %v2056_v7, %v2071_v49 }
0x2599   :  { %v3475_v18 = vsel %vm2072_vm6, 1.0, %v4219_v2  ;;  %vm3427_vm6 = vcmask 1041408  }
0x259a   :  { %3928 = vmatmul.mubr.msk.f32.vlgmr.msra.gmra.mxu0 %vm37_vm1, %v3475_v18 }
0x259b   :  { %3942 = vmatpush3.msra.mxu0 %v4564_v59  ;;  %3949 = vmatprep.mubr.msk.f32.mxu0 %vm4220_vm0, %v4219_v2 }
0x259c   :  { %3943 = vmatprep.subr.mxu0 %v4219_v2 }
0x259d   :  { %3944 = vmatpush3.msra.mxu0 %v4569_v60 }
0x259e   :  { %3945 = vmatprep.subr.mxu0 %v4219_v2 }
0x259f   :  { %3946 = vmatpush3.msra.mxu0 %v4587_v8 }
0x25a0   :  { %3947 = vmatprep.subr.mxu0 %v4219_v2 }
0x25a1   :  { %3948 = vmatpush3.msra.mxu0 %v4594_v10 }
0x25a2   :  { %3963 = vmatprep.subr.mxu0 %v4219_v2 }
0x265a   :  { %v2214_v50 = vpop.f32.mrf.mxu0 }
0x265b   :  { %v2215_v51 = vadd.f32 %v2214_v50, %v2141_v3 }
0x265c   :  { %v3929_v52 = vpop.f32.mrf.mxu0 }
0x265d   :  { %4169 = vtanh.f32 %v2215_v51  ;;  %v3478_v56 = vmul.f32 -1.442695, %v2215_v51 }
0x265f   :  { %4171 = vpow2.f32 %v3478_v56 }
0x266a   :  { %v4170_v55 = vpop.eup %4169 }
0x266b   :  { %2227 = vrot.lane.b32.xlu0 %v4170_v55, %s4221_s9 }
0x266c   :  { %v4172_v57 = vpop.eup %4171 }
0x266d   :  { %v2221_v58 = vadd.f32 1.0, %v4172_v57 }
0x266f   :  { %4173 = vrcp.f32 %v2221_v58 }
0x267c   :  { %v4174_v63 = vpop.eup %4173 }
0x267d   :  { %v2225_v5 = vmul.f32 %v4174_v63, %v4773_v20 }
0x26dd   :  { %v2228_v0 = vpop.permute.xlu0 %2227 }
0x26de   :  { %v2230_v1 = vmul.f32 %v4174_v63, %v2228_v0 }
0x26e0   :  { %2232 = vrot.lane.b32.xlu1 %v2230_v1, %s4222_s10 }
0x2752   :  { %v2233_v6 = vpop.permute.xlu1 %2232 }
0x2753   :  { %v4823_v11 = vadd.f32 %v2233_v6, %v2225_v5 }
0x2755   :  { %4175 = vtanh.f32 %v4823_v11 }
0x2762   :  { %v4176_v12 = vpop.eup %4175 }
0x2763   :  { %2238 = vrot.lane.b32.xlu0 %v4176_v12, %s4221_s9 }
0x27d5   :  { %v2239_v13 = vpop.permute.xlu0 %2238 }
0x27d6   :  { %v2241_v14 = vmul.f32 %v4174_v63, %v2239_v13 }
0x27d8   :  { %2243 = vrot.lane.b32.xlu1 %v2241_v14, %s4222_s10 }
0x284a   :  { %v2244_v16 = vpop.permute.xlu1 %2243 }
0x284b   :  { %3939 = vmatmul.mubr.msk.f32.vlgmr.msra.gmra.mxu1 %vm37_vm1, %v2244_v16  ;;  %3950 = vmatmul.mubr.msk.f32.vlgmr.msra.gmra.mxu0 %vm37_vm1, %v2244_v16 }
0x284c   :  { %3953 = vmatpush3.msra.mxu1 %v4688_v54  ;;  %3960 = vmatprep.mubr.msk.f32.mxu1 %vm4220_vm0, %v4219_v2 }
0x284d   :  { %3954 = vmatprep.subr.mxu1 %v4219_v2  ;;  %3964 = vmatpush3.msra.mxu0 %v4629_v32 }
0x284e   :  { %3955 = vmatpush3.msra.mxu1 %v4695_v61  ;;  %3965 = vmatprep.subr.mxu0 %v4219_v2 }
0x284f   :  { %3956 = vmatprep.subr.mxu1 %v4219_v2  ;;  %3966 = vmatpush3.msra.mxu0 %v4634_v9 }
0x2850   :  { %3957 = vmatpush3.msra.mxu1 %v4702_v62  ;;  %3967 = vmatprep.subr.mxu0 %v4219_v2 }
0x2851   :  { %3958 = vmatprep.subr.mxu1 %v4219_v2  ;;  %3968 = vmatpush3.msra.mxu0 %v4641_v33 }
0x2852   :  { %3959 = vmatpush3.msra.mxu1 %v4618_v21  ;;  %3969 = vmatprep.subr.mxu0 %v4219_v2 }
0x2853   :  { %3974 = vmatprep.subr.mxu1 %v4219_v2  ;;  %3970 = vmatpush3.msra.mxu0 %v4648_v34 }
0x2854   :  { %3971 = vmatprep.mubr.msk.f32.mxu0 %vm4220_vm0, %v4219_v2  ;;  %3985 = vmatprep.subr.mxu0 %v4219_v2 }
0x290b   :  { %v2313_v17 = vpop.f32.mrf.mxu1  ;;  %v2407_v20 = vpop.f32.mrf.mxu0 }
0x290c   :  { %v4851_v22 = vadd.f32 %v4673_v39, %v2313_v17 }
0x290d   :  { %v3940_v23 = vpop.f32.mrf.mxu1  ;;  %v3951_v24 = vpop.f32.mrf.mxu0 }
0x290e   :  { %vm2318_vm7 = vcmp.lt.s32.totalorder %v4851_v22, 0  ;;  %v2319_v25 = vxor.u32 2147483647, %v4851_v22 }
0x2910   :  { %v2320_v26 = vsel %vm2318_vm7, %v2319_v25, %v4851_v22  ;;  %vm3428_vm7 = vcmask 1043458  }
0x2911   :  { %v2321_v3 = vand.u32 4294967264, %v2320_v26 }
0x2913   :  { %v2322_v28 = vor.u32 %v2321_v3, %v4680_v47 }
0x2915   :  { %v2323_v15 = vsel %vm1524_vm12, %v2322_v28, 2147483648 }
0x2916   :  { %v2325_v4 = vshra.s32 %v2323_v15, 16  ;;  %v2324_v30 = vand.u32 65535, %v2323_v15 }
0x2918   :  { %v2327_v29 = vcvt.s32.f32 %v2325_v4  ;;  %v2326_v35 = vcvt.s32.f32 %v2324_v30 }
0x291a   :  { %2328 = vmax.xlane.f32.xlu0 %v2327_v29 }
0x29a3   :  { %v2329_v7 = vpop.xlane.xlu0 %2328 }
0x29a4   :  { %vm2330_vm8 = vcmp.eq.f32.partialorder %v2327_v29, %v2329_v7  ;;  %v2335_v37 = vcvt.f32.s32 %v2329_v7 }
0x29a5   :  { %v2331_v36 = vsel %vm2330_vm8, %v2326_v35, -inf  ;;  %vm3429_vm8 = vmor %vm3428_vm7, %vm3427_vm6 }
0x29a6   :  { %2332 = vmax.xlane.f32.xlu1 %v2331_v36  ;;  %v2336_v40 = vshll.u32 %v2335_v37, 16 }
0x2a2f   :  { %v2333_v38 = vpop.xlane.xlu1 %2332 }
0x2a30   :  { %v2334_v41 = vcvt.f32.s32 %v2333_v38 }
0x2a32   :  { %v2337_v42 = vadd.s32 %v2336_v40, %v2334_v41 }
0x2a34   :  { %vm2338_vm9 = vcmp.eq.s32.totalorder %v2322_v28, %v2337_v42 }
0x2a35   :  { %v3480_v44 = vsel %vm2338_vm9, 1.0, %v4219_v2  ;;  %vm3430_vm9 = vcmask 521220  }
0x2a36   :  { %3961 = vmatmul.mubr.msk.f32.vlgmr.msra.gmra.mxu1 %vm37_vm1, %v3480_v44 }
0x2a37   :  { %3975 = vmatpush3.msra.mxu1 %v4564_v59  ;;  %3982 = vmatprep.mubr.msk.f32.mxu1 %vm4220_vm0, %v4219_v2 }
0x2a38   :  { %3976 = vmatprep.subr.mxu1 %v4219_v2 }
0x2a39   :  { %3977 = vmatpush3.msra.mxu1 %v4569_v60 }
0x2a3a   :  { %3978 = vmatprep.subr.mxu1 %v4219_v2 }
0x2a3b   :  { %3979 = vmatpush3.msra.mxu1 %v4587_v8 }
0x2a3c   :  { %3980 = vmatprep.subr.mxu1 %v4219_v2 }
0x2a3d   :  { %3981 = vmatpush3.msra.mxu1 %v4594_v10 }
0x2a3e   :  { %3996 = vmatprep.subr.mxu1 %v4219_v2 }
0x2af6   :  { %v2480_v45 = vpop.f32.mrf.mxu1 }
0x2af7   :  { %v2481_v46 = vadd.f32 %v2480_v45, %v2407_v20 }
0x2af8   :  { %v3962_v48 = vpop.f32.mrf.mxu1 }
0x2af9   :  { %4177 = vtanh.f32 %v2481_v46  ;;  %v3483_v18 = vmul.f32 -1.442695, %v2481_v46 }
0x2afb   :  { %4179 = vpow2.f32 %v3483_v18 }
0x2b06   :  { %v4178_v49 = vpop.eup %4177 }
0x2b07   :  { %2493 = vrot.lane.b32.xlu0 %v4178_v49, %s4221_s9 }
0x2b08   :  { %v4180_v50 = vpop.eup %4179 }
0x2b09   :  { %v2487_v51 = vadd.f32 1.0, %v4180_v50 }
0x2b0b   :  { %4181 = vrcp.f32 %v2487_v51 }
0x2b18   :  { %v4182_v52 = vpop.eup %4181 }
0x2b19   :  { %v2491_v57 = vmul.f32 %v4182_v52, %v4823_v11 }
0x2b79   :  { %v2494_v55 = vpop.permute.xlu0 %2493 }
0x2b7a   :  { %v2496_v56 = vmul.f32 %v4182_v52, %v2494_v55 }
0x2b7c   :  { %2498 = vrot.lane.b32.xlu1 %v2496_v56, %s4222_s10 }
0x2bee   :  { %v2499_v58 = vpop.permute.xlu1 %2498 }
0x2bef   :  { %v4873_v63 = vadd.f32 %v2499_v58, %v2491_v57 }
0x2bf1   :  { %4183 = vtanh.f32 %v4873_v63 }
0x2bfe   :  { %v4184_v0 = vpop.eup %4183 }
0x2bff   :  { %2504 = vrot.lane.b32.xlu0 %v4184_v0, %s4221_s9 }
0x2c71   :  { %v2505_v1 = vpop.permute.xlu0 %2504 }
0x2c72   :  { %v2507_v5 = vmul.f32 %v4182_v52, %v2505_v1 }
0x2c74   :  { %2509 = vrot.lane.b32.xlu1 %v2507_v5, %s4222_s10 }
0x2ce6   :  { %v2510_v6 = vpop.permute.xlu1 %2509 }
0x2ce7   :  { %3972 = vmatmul.mubr.msk.f32.vlgmr.msra.gmra.mxu0 %vm37_vm1, %v2510_v6  ;;  %3983 = vmatmul.mubr.msk.f32.vlgmr.msra.gmra.mxu1 %vm37_vm1, %v2510_v6 }
0x2ce8   :  { %3986 = vmatpush3.msra.mxu0 %v4688_v54  ;;  %3993 = vmatprep.mubr.msk.f32.mxu0 %vm4220_vm0, %v4219_v2 }
0x2ce9   :  { %3987 = vmatprep.subr.mxu0 %v4219_v2  ;;  %3997 = vmatpush3.msra.mxu1 %v4629_v32 }
0x2cea   :  { %3988 = vmatpush3.msra.mxu0 %v4695_v61  ;;  %3998 = vmatprep.subr.mxu1 %v4219_v2 }
0x2ceb   :  { %3989 = vmatprep.subr.mxu0 %v4219_v2  ;;  %3999 = vmatpush3.msra.mxu1 %v4634_v9 }
0x2cec   :  { %3990 = vmatpush3.msra.mxu0 %v4702_v62  ;;  %4000 = vmatprep.subr.mxu1 %v4219_v2 }
0x2ced   :  { %3991 = vmatprep.subr.mxu0 %v4219_v2  ;;  %4001 = vmatpush3.msra.mxu1 %v4641_v33 }
0x2cee   :  { %3992 = vmatpush3.msra.mxu0 %v4618_v21  ;;  %4002 = vmatprep.subr.mxu1 %v4219_v2 }
0x2cef   :  { %4007 = vmatprep.subr.mxu0 %v4219_v2  ;;  %4003 = vmatpush3.msra.mxu1 %v4648_v34 }
0x2cf0   :  { %4004 = vmatprep.mubr.msk.f32.mxu1 %vm4220_vm0, %v4219_v2  ;;  %4018 = vmatprep.subr.mxu1 %v4219_v2 }
0x2da7   :  { %v2579_v11 = vpop.f32.mrf.mxu0  ;;  %v2673_v12 = vpop.f32.mrf.mxu1 }
0x2da8   :  { %v4901_v13 = vadd.f32 %v4673_v39, %v2579_v11 }
0x2da9   :  { %v3973_v14 = vpop.f32.mrf.mxu0  ;;  %v3984_v16 = vpop.f32.mrf.mxu1 }
0x2daa   :  { %vm2584_vm11 = vcmp.lt.s32.totalorder %v4901_v13, 0  ;;  %v2585_v17 = vxor.u32 2147483647, %v4901_v13 }
0x2dac   :  { %v2586_v20 = vsel %vm2584_vm11, %v2585_v17, %v4901_v13  ;;  %vm3431_vm11 = vmor %vm3430_vm9, %vm3429_vm8 }
0x2dad   :  { %v2587_v23 = vand.u32 4294967264, %v2586_v20 }
0x2daf   :  { %v2588_v24 = vor.u32 %v2587_v23, %v4680_v47 }
0x2db1   :  { %v2589_v25 = vsel %vm1524_vm12, %v2588_v24, 2147483648 }
0x2db2   :  { %v2591_v26 = vshra.s32 %v2589_v25, 16  ;;  %v2590_v28 = vand.u32 65535, %v2589_v25 }
0x2db4   :  { %v2593_v3 = vcvt.s32.f32 %v2591_v26  ;;  %v2592_v4 = vcvt.s32.f32 %v2590_v28  ;;  %v4209_v26 = vld [vmem:[%s5057_s1 + $0x58] sm:$0xff]  ;;  %v4211_v28 = vld [vmem:[%s5057_s1 + $0x48] sm:$0xff] }
0x2db6   :  { %2594 = vmax.xlane.f32.xlu0 %v2593_v3 }
0x2e3f   :  { %v2595_v15 = vpop.xlane.xlu0 %2594 }
0x2e40   :  { %vm2596_vm13 = vcmp.eq.f32.partialorder %v2593_v3, %v2595_v15  ;;  %v2601_v30 = vcvt.f32.s32 %v2595_v15  ;;  %v4210_v3 = vld [vmem:[%s5057_s1 + $0x50] sm:$0xff]  ;;  %v4212_v15 = vld [vmem:[%s5057_s1 + $0x40] sm:$0xff] }
0x2e41   :  { %v2597_v29 = vsel %vm2596_vm13, %v2592_v4, -inf }
0x2e42   :  { %2598 = vmax.xlane.f32.xlu1 %v2597_v29  ;;  %v2602_v35 = vshll.u32 %v2601_v30, 16 }
0x2ecb   :  { %v2599_v7 = vpop.xlane.xlu1 %2598 }
0x2ecc   :  { %v2600_v36 = vcvt.f32.s32 %v2599_v7 }
0x2ece   :  { %v2603_v37 = vadd.s32 %v2602_v35, %v2600_v36 }
0x2ed0   :  { %vm2604_vm14 = vcmp.eq.s32.totalorder %v2588_v24, %v2603_v37 }
0x2ed1   :  { %v3485_v38 = vsel %vm2604_vm14, 1.0, %v4219_v2 }
0x2ed2   :  { %3994 = vmatmul.mubr.msk.f32.vlgmr.msra.gmra.mxu0 %vm37_vm1, %v3485_v38 }
0x2ed3   :  { %4008 = vmatpush3.msra.mxu0 %v4564_v59  ;;  %4015 = vmatprep.mubr.msk.f32.mxu0 %vm4220_vm0, %v4219_v2 }
0x2ed4   :  { %4009 = vmatprep.subr.mxu0 %v4219_v2 }
0x2ed5   :  { %4010 = vmatpush3.msra.mxu0 %v4569_v60 }
0x2ed6   :  { %4011 = vmatprep.subr.mxu0 %v4219_v2 }
0x2ed7   :  { %4012 = vmatpush3.msra.mxu0 %v4587_v8 }
0x2ed8   :  { %4013 = vmatprep.subr.mxu0 %v4219_v2 }
0x2ed9   :  { %4014 = vmatpush3.msra.mxu0 %v4594_v10 }
0x2eda   :  { %4029 = vmatprep.subr.mxu0 %v4219_v2 }
0x2f92   :  { %v2746_v40 = vpop.f32.mrf.mxu0 }
0x2f93   :  { %v2747_v41 = vadd.f32 %v2746_v40, %v2673_v12 }
0x2f94   :  { %v3995_v59 = vpop.f32.mrf.mxu0 }
0x2f95   :  { %4185 = vtanh.f32 %v2747_v41  ;;  %v3488_v44 = vmul.f32 -1.442695, %v2747_v41 }
0x2f97   :  { %4187 = vpow2.f32 %v3488_v44 }
0x2fa2   :  { %v4186_v42 = vpop.eup %4185 }
0x2fa3   :  { %2759 = vrot.lane.b32.xlu0 %v4186_v42, %s4221_s9 }
0x2fa4   :  { %v4188_v60 = vpop.eup %4187 }
0x2fa5   :  { %v2753_v45 = vadd.f32 1.0, %v4188_v60 }
0x2fa7   :  { %4189 = vrcp.f32 %v2753_v45 }
0x2fb4   :  { %v4190_v46 = vpop.eup %4189 }
0x2fb5   :  { %v2757_v10 = vmul.f32 %v4190_v46, %v4873_v63 }
0x3015   :  { %v2760_v8 = vpop.permute.xlu0 %2759 }
0x3016   :  { %v2762_v48 = vmul.f32 %v4190_v46, %v2760_v8 }
0x3018   :  { %2764 = vrot.lane.b32.xlu1 %v2762_v48, %s4222_s10  ;;  %v4213_v48 = vld [vmem:[%s5059_s2 + $0x98] sm:$0xff] }
0x308a   :  { %v2765_v49 = vpop.permute.xlu1 %2764 }
0x308b   :  { %v4923_v18 = vadd.f32 %v2765_v49, %v2757_v10  ;;  %v4215_v10 = vld [vmem:[%s5059_s2 + $0x88] sm:$0xff] }
0x308d   :  { %4191 = vtanh.f32 %v4923_v18 }
0x309a   :  { %v4192_v50 = vpop.eup %4191 }
0x309b   :  { %2770 = vrot.lane.b32.xlu0 %v4192_v50, %s4221_s9 }
0x310d   :  { %v2771_v51 = vpop.permute.xlu0 %2770 }
0x310e   :  { %v2773_v52 = vmul.f32 %v4190_v46, %v2771_v51 }
0x3110   :  { %2775 = vrot.lane.b32.xlu1 %v2773_v52, %s4222_s10 }
0x3182   :  { %v2776_v55 = vpop.permute.xlu1 %2775 }
0x3183   :  { %4005 = vmatmul.mubr.msk.f32.vlgmr.msra.gmra.mxu1 %vm37_vm1, %v2776_v55  ;;  %4016 = vmatmul.mubr.msk.f32.vlgmr.msra.gmra.mxu0 %vm37_vm1, %v2776_v55 }
0x3184   :  { %4019 = vmatpush3.msra.mxu1 %v4688_v54  ;;  %4026 = vmatprep.mubr.msk.f32.mxu1 %vm4220_vm0, %v4219_v2 }
0x3185   :  { %4020 = vmatprep.subr.mxu1 %v4219_v2  ;;  %4030 = vmatpush3.msra.mxu0 %v4629_v32 }
0x3186   :  { %4021 = vmatpush3.msra.mxu1 %v4695_v61  ;;  %4031 = vmatprep.subr.mxu0 %v4219_v2 }
0x3187   :  { %4022 = vmatprep.subr.mxu1 %v4219_v2  ;;  %4032 = vmatpush3.msra.mxu0 %v4634_v9 }
0x3188   :  { %4023 = vmatpush3.msra.mxu1 %v4702_v62  ;;  %4033 = vmatprep.subr.mxu0 %v4219_v2 }
0x3189   :  { %4024 = vmatprep.subr.mxu1 %v4219_v2  ;;  %4034 = vmatpush3.msra.mxu0 %v4641_v33 }
0x318a   :  { %4025 = vmatpush3.msra.mxu1 %v4618_v21  ;;  %4035 = vmatprep.subr.mxu0 %v4219_v2 }
0x318b   :  { %4040 = vmatprep.subr.mxu1 %v4219_v2  ;;  %4036 = vmatpush3.msra.mxu0 %v4648_v34 }
0x318c   :  { %4037 = vmatprep.mubr.msk.f32.mxu0 %vm4220_vm0, %v4219_v2  ;;  %4051 = vmatprep.subr.mxu0 %v4219_v2 }
0x3243   :  { %v2845_v32 = vpop.f32.mrf.mxu1  ;;  %v2939_v9 = vpop.f32.mrf.mxu0 }
0x3244   :  { %v4951_v56 = vadd.f32 %v4673_v39, %v2845_v32 }
0x3245   :  { %v4006_v57 = vpop.f32.mrf.mxu1  ;;  %v4017_v33 = vpop.f32.mrf.mxu0 }
0x3246   :  { %vm2850_vm15 = vcmp.lt.s32.totalorder %v4951_v56, 0  ;;  %v2851_v21 = vxor.u32 2147483647, %v4951_v56 }
0x3248   :  { %v2852_v58 = vsel %vm2850_vm15, %v2851_v21, %v4951_v56 }
0x3249   :  { %v2853_v63 = vand.u32 4294967264, %v2852_v58 }
0x324b   :  { %v2854_v34 = vor.u32 %v2853_v63, %v4680_v47 }
0x324d   :  { %v2855_v0 = vsel %vm1524_vm12, %v2854_v34, 2147483648 }
0x324e   :  { %v2857_v1 = vshra.s32 %v2855_v0, 16  ;;  %v2856_v6 = vand.u32 65535, %v2855_v0 }
0x3250   :  { %v2859_v5 = vcvt.s32.f32 %v2857_v1  ;;  %v2858_v12 = vcvt.s32.f32 %v2856_v6 }
0x3252   :  { %2860 = vmax.xlane.f32.xlu0 %v2859_v5 }
0x32db   :  { %v2861_v11 = vpop.xlane.xlu0 %2860 }
0x32dc   :  { %vm2862_vm2 = vcmp.eq.f32.partialorder %v2859_v5, %v2861_v11  ;;  %v2867_v16 = vcvt.f32.s32 %v2861_v11 }
0x32dd   :  { %v2863_v14 = vsel %vm2862_vm2, %v2858_v12, -inf }
0x32de   :  { %2864 = vmax.xlane.f32.xlu1 %v2863_v14  ;;  %v2868_v20 = vshll.u32 %v2867_v16, 16 }
0x3367   :  { %v2865_v17 = vpop.xlane.xlu1 %2864 }
0x3368   :  { %v2866_v23 = vcvt.f32.s32 %v2865_v17 }
0x336a   :  { %v2869_v24 = vadd.s32 %v2868_v20, %v2866_v23 }
0x336c   :  { %vm2870_vm3 = vcmp.eq.s32.totalorder %v2854_v34, %v2869_v24 }
0x336d   :  { %v3490_v25 = vsel %vm2870_vm3, 1.0, %v4219_v2 }
0x336e   :  { %4027 = vmatmul.mubr.msk.f32.vlgmr.msra.gmra.mxu1 %vm37_vm1, %v3490_v25 }
0x336f   :  { %4041 = vmatpush3.msra.mxu1 %v4209_v26  ;;  %4048 = vmatprep.mubr.msk.f32.mxu1 %vm4220_vm0, %v4219_v2 }
0x3370   :  { %4042 = vmatprep.subr.mxu1 %v4219_v2 }
0x3371   :  { %4043 = vmatpush3.msra.mxu1 %v4210_v3 }
0x3372   :  { %4044 = vmatprep.subr.mxu1 %v4219_v2 }
0x3373   :  { %4045 = vmatpush3.msra.mxu1 %v4211_v28 }
0x3374   :  { %4046 = vmatprep.subr.mxu1 %v4219_v2 }
0x3375   :  { %4047 = vmatpush3.msra.mxu1 %v4212_v15 }
0x3376   :  { %4062 = vmatprep.subr.mxu1 %v4219_v2 }
0x342e   :  { %v3012_v4 = vpop.f32.mrf.mxu1 }
0x342f   :  { %v3013_v29 = vadd.f32 %v3012_v4, %v2939_v9 }
0x3430   :  { %v4028_v30 = vpop.f32.mrf.mxu1 }
0x3431   :  { %4193 = vtanh.f32 %v3013_v29  ;;  %v3493_v35 = vmul.f32 -1.442695, %v3013_v29 }
0x3433   :  { %4195 = vpow2.f32 %v3493_v35 }
0x343e   :  { %v4194_v7 = vpop.eup %4193 }
0x343f   :  { %3025 = vrot.lane.b32.xlu0 %v4194_v7, %s4221_s9 }
0x3440   :  { %v4196_v36 = vpop.eup %4195 }
0x3441   :  { %v3019_v37 = vadd.f32 1.0, %v4196_v36 }
0x3443   :  { %4197 = vrcp.f32 %v3019_v37 }
0x3450   :  { %v4198_v38 = vpop.eup %4197 }
0x3451   :  { %v3023_v59 = vmul.f32 %v4198_v38, %v4923_v18 }
0x34b1   :  { %v3026_v40 = vpop.permute.xlu0 %3025 }
0x34b2   :  { %v3028_v41 = vmul.f32 %v4198_v38, %v3026_v40 }
0x34b4   :  { %3030 = vrot.lane.b32.xlu1 %v3028_v41, %s4222_s10  ;;  %v4224_v41 = vmov 1983009808  }
0x3526   :  { %v3031_v42 = vpop.permute.xlu1 %3030 }
0x3527   :  { %v4981_v44 = vadd.f32 %v3031_v42, %v3023_v59 }
0x3529   :  { %4199 = vtanh.f32 %v4981_v44 }
0x3536   :  { %v4200_v60 = vpop.eup %4199 }
0x3537   :  { %3036 = vrot.lane.b32.xlu0 %v4200_v60, %s4221_s9 }
0x35a9   :  { %v3037_v45 = vpop.permute.xlu0 %3036 }
0x35aa   :  { %v3039_v46 = vmul.f32 %v4198_v38, %v3037_v45 }
0x35ac   :  { %3041 = vrot.lane.b32.xlu1 %v3039_v46, %s4222_s10 }
0x361e   :  { %v3042_v8 = vpop.permute.xlu1 %3041 }
0x361f   :  { %4038 = vmatmul.mubr.msk.f32.vlgmr.msra.gmra.mxu0 %vm37_vm1, %v3042_v8  ;;  %4049 = vmatmul.mubr.msk.f32.vlgmr.msra.gmra.mxu1 %vm37_vm1, %v3042_v8 }
0x3620   :  { %4052 = vmatpush3.msra.mxu0 %v4688_v54  ;;  %4059 = vmatprep.mubr.msk.f32.mxu0 %vm4220_vm0, %v4219_v2  ;;  %v4214_v54 = vld [vmem:[%s5059_s2 + $0x90] sm:$0xff] }
0x3621   :  { %4053 = vmatprep.subr.mxu0 %v4219_v2  ;;  %4063 = vmatpush3.msra.mxu1 %v4213_v48 }
0x3622   :  { %4054 = vmatpush3.msra.mxu0 %v4695_v61  ;;  %4064 = vmatprep.subr.mxu1 %v4219_v2  ;;  %v4216_v61 = vld [vmem:[%s5057_s1 + $0x60] sm:$0xff] }
0x3623   :  { %4055 = vmatprep.subr.mxu0 %v4219_v2  ;;  %4065 = vmatpush3.msra.mxu1 %v4214_v54 }
0x3624   :  { %4056 = vmatpush3.msra.mxu0 %v4702_v62  ;;  %4066 = vmatprep.subr.mxu1 %v4219_v2  ;;  %v4217_v62 = vld [vmem:[%s5059_s2 + $0x80] sm:$0xff] }
0x3625   :  { %4057 = vmatprep.subr.mxu0 %v4219_v2  ;;  %4067 = vmatpush3.msra.mxu1 %v4215_v10 }
0x3626   :  { %4058 = vmatpush3.msra.mxu0 %v4216_v61  ;;  %4068 = vmatprep.subr.mxu1 %v4219_v2 }
0x3627   :  { %4069 = vmatpush3.msra.mxu1 %v4217_v62  ;;  %4070 = vmatprep.mubr.msk.f32.mxu1 %vm4220_vm0, %v4219_v2 }
0x36df   :  { %v3111_v49 = vpop.f32.mrf.mxu0  ;;  %v3205_v18 = vpop.f32.mrf.mxu1 }
0x36e0   :  { %v5017_v50 = vadd.f32 %v4673_v39, %v3111_v49 }
0x36e1   :  { %v4039_v51 = vpop.f32.mrf.mxu0  ;;  %v4050_v52 = vpop.f32.mrf.mxu1 }
0x36e2   :  { %vm3116_vm4 = vcmp.lt.s32.totalorder %v5017_v50, 0  ;;  %v3117_v55 = vxor.u32 2147483647, %v5017_v50 }
0x36e4   :  { %v3118_v32 = vsel %vm3116_vm4, %v3117_v55, %v5017_v50 }
0x36e5   :  { %v3119_v9 = vand.u32 4294967264, %v3118_v32 }
0x36e7   :  { %v3120_v57 = vor.u32 %v3119_v9, %v4680_v47 }
0x36e9   :  { %v3121_v33 = vsel %vm1524_vm12, %v3120_v57, 2147483648  ;;  %vm3401_vm12 = vcmask 785408  }
0x36ea   :  { %v3123_v21 = vshra.s32 %v3121_v33, 16  ;;  %v3122_v63 = vand.u32 65535, %v3121_v33 }
0x36ec   :  { %v3125_v58 = vcvt.s32.f32 %v3123_v21  ;;  %v3124_v39 = vcvt.s32.f32 %v3122_v63 }
0x36ee   :  { %3126 = vmax.xlane.f32.xlu0 %v3125_v58 }
0x3777   :  { %v3127_v34 = vpop.xlane.xlu0 %3126 }
0x3778   :  { %vm3128_vm0 = vcmp.eq.f32.partialorder %v3125_v58, %v3127_v34  ;;  %v3133_v1 = vcvt.f32.s32 %v3127_v34 }
0x3779   :  { %v3129_v0 = vsel %vm3128_vm0, %v3124_v39, -inf }
0x377a   :  { %3130 = vmax.xlane.f32.xlu1 %v3129_v0  ;;  %v3134_v6 = vshll.u32 %v3133_v1, 16 }
0x3803   :  { %v3131_v5 = vpop.xlane.xlu1 %3130 }
0x3804   :  { %v3132_v11 = vcvt.f32.s32 %v3131_v5 }
0x3806   :  { %v3135_v12 = vadd.s32 %v3134_v6, %v3132_v11 }
0x3808   :  { %vm3136_vm5 = vcmp.eq.s32.totalorder %v3120_v57, %v3135_v12 }
0x3809   :  { %v3495_v14 = vsel %vm3136_vm5, 1.0, %v4219_v2 }
0x380a   :  { %4060 = vmatmul.mubr.msk.f32.vlgmr.msra.gmra.mxu0 %vm37_vm1, %v3495_v14 }
0x38ca   :  { %v3278_v47 = vpop.f32.mrf.mxu0 }
0x38cb   :  { %v3279_v16 = vadd.f32 %v3278_v47, %v3205_v18 }
0x38cc   :  { %v4061_v17 = vpop.f32.mrf.mxu0 }
0x38cd   :  { %4201 = vtanh.f32 %v3279_v16  ;;  %v3498_v23 = vmul.f32 -1.442695, %v3279_v16 }
0x38cf   :  { %4203 = vpow2.f32 %v3498_v23 }
0x38da   :  { %v4202_v20 = vpop.eup %4201 }
0x38db   :  { %3291 = vrot.lane.b32.xlu0 %v4202_v20, %s4221_s9 }
0x38dc   :  { %v4204_v24 = vpop.eup %4203 }
0x38dd   :  { %v3285_v25 = vadd.f32 1.0, %v4204_v24 }
0x38df   :  { %4205 = vrcp.f32 %v3285_v25 }
0x38ec   :  { %v4206_v26 = vpop.eup %4205 }
0x38ed   :  { %v3289_v2 = vmul.f32 %v4206_v26, %v4981_v44 }
0x394d   :  { %v3292_v3 = vpop.permute.xlu0 %3291 }
0x394e   :  { %v3294_v28 = vmul.f32 %v4206_v26, %v3292_v3 }
0x3950   :  { %3296 = vrot.lane.b32.xlu1 %v3294_v28, %s4222_s10 }
0x39c2   :  { %v3297_v15 = vpop.permute.xlu1 %3296 }
0x39c3   :  { %v3299_v4 = vadd.f32 %v3297_v15, %v3289_v2 }
0x39c5   :  { %4207 = vtanh.f32 %v3299_v4 }
0x39d2   :  { %v4208_v29 = vpop.eup %4207 }
0x39d3   :  { %3302 = vrot.lane.b32.xlu0 %v4208_v29, %s4221_s9 }
0x39d7   :  { %3387 = vrot.lane.b32.xlu0 %v4851_v22, %s4222_s10 }
0x39db   :  { %3390 = vrot.lane.b32.xlu0 %v4901_v13, %s4221_s9  ;;  %v4218_v13 = vld [vmem:[%s5059_s2 + $0xa2] ss:$0 sm:$0xff] }
0x39df   :  { %3393 = vrot.lane.b32.xlu0 %v4951_v56, %s4223_s11 }
0x3a45   :  { %v3303_v30 = vpop.permute.xlu0 %3302 }
0x3a46   :  { %v3305_v7 = vmul.f32 %v4206_v26, %v3303_v30 }
0x3a48   :  { %3307 = vrot.lane.b32.xlu1 %v3305_v7, %s4222_s10 }
0x3a49   :  { %v3388_v37 = vpop.permute.xlu0 %3387 }
0x3a4a   :  { %v3403_v60 = vsel %vm37_vm1, %v4801_v27, %v3388_v37 }
0x3a4c   :  { %3381 = vrot.lane.b32.xlu1 %v4676_v43, %s4221_s9  ;;  %v3412_v43 = vunpack.c.l.s4 %v4224_v41 }
0x3a4d   :  { %v3391_v40 = vpop.permute.xlu0 %3390 }
0x3a4e   :  { %v3413_v44 = vunpack.c.0.s8 %v3412_v43  ;;  %v3404_v46 = vsel %vm1085_vm10, %v3403_v60, %v3391_v40 }
0x3a50   :  { %3384 = vrot.lane.b32.xlu1 %v4751_v31, %s4223_s11  ;;  %v3416_v48 = vsub.s32 %v3413_v44, %v4612_v19 }
0x3a51   :  { %v3394_v31 = vpop.permute.xlu0 %3393 }
0x3a52   :  { %v3405_v8 = vsel %vm3401_vm12, %v3404_v46, %v3394_v31 }
0x3aba   :  { %v3308_v35 = vpop.permute.xlu1 %3307 }
0x3abb   :  { %4071 = vmatmul.mubr.msk.f32.vlgmr.msra.gmra.mxu1 %vm37_vm1, %v3308_v35 }
0x3abe   :  { %v3382_v38 = vpop.permute.xlu1 %3381 }
0x3abf   :  { %v3400_v42 = vsel %vm1085_vm10, %v4551_v53, %v3382_v38 }
0x3ac2   :  { %v3385_v59 = vpop.permute.xlu1 %3384 }
0x3ac3   :  { %v3402_v45 = vsel %vm3401_vm12, %v3400_v42, %v3385_v59 }
0x3ac4   :  { %v3410_v54 = vcombine.low %v3402_v45, %v3405_v8 }
0x3ac6   :  { %v3417_v53 = vrot.slane %v3410_v54, %v3416_v48 }
0x3b7b   :  { %v3377_v22 = vpop.f32.mrf.mxu1 }
0x3b7c   :  { %v3378_v36 = vadd.f32 %v4218_v13, %v3377_v22 }
0x3b7d   :  { %v4072_v56 = vpop.f32.mrf.mxu1 }
0x3b7e   :  { %3397 = vrot.lane.b32.xlu1 %v3378_v36, %s4222_s10 }
0x3bf0   :  { %v3398_v10 = vpop.permute.xlu1 %3397 }
0x3bf1   :  { %v3406_v61 = vsel %vm37_vm1, %v5017_v50, %v3398_v10 }
0x3bf2   :  { %v3424_v62 = vrot.slane %v3406_v61, %v3416_v48 }
0x3bf4   :  { %v3425_v49 = vcombine.low %v3417_v53, %v3424_v62 }
0x3bf6   :  { %3432 = vst.msk [vmem:[%s5060_s3] sm:$0x3f] %vm3431_vm11, %v3425_v49 }

</bundles_post_ra>
